<compile_context>
chip_gen: v7x
topology: tpu7x:2x2x1
jax: 0.10.0
libtpu: 0.0.40
codegen_flags: <defaults>
</compile_context>

<pallas_src>
import math
import functools
import numpy as np
import jax
import jax.numpy as jnp
from jax.experimental import pallas as pl
from jax.experimental.pallas import tpu as pltpu

f32 = jnp.float32
SQRT2 = math.sqrt(2.0)
INV_SQRT2 = 1.0 / math.sqrt(2.0)
_HIGHEST = jax.lax.Precision.HIGHEST


def _recip(a):
    """EUP approximate reciprocal + one Newton-Raphson refinement (exactness
    protected to ~1e-8 relative, far inside the 1e-3 check)."""
    r = pl.reciprocal(a, approx=True)
    return r * (2.0 - a * r)


def _bigabp_kernel(hr_ref, hi_ref, xr_ref, xi_ref, vx_ref, vh_ref,
                   yr_ref, yi_ref, pm_ref,
                   rk_ref, sm_ref, tk_ref, sn_ref, par_ref,
                   out_ref, *, M, K, XOFF):
    MK = M * K
    BN = hr_ref.shape[0]

    # scalar (learnable) parameters live in SMEM
    alpha = par_ref[0]
    beta = par_ref[1]
    gamma = par_ref[2]
    phi = par_ref[3]
    n0 = par_ref[4]

    Hr = hr_ref[...]          # (BN, MK)   sublane = b*N + n, lane = m*K + k
    Hi = hi_ref[...]
    Xr = xr_ref[...]
    Xi = xi_ref[...]
    vX = vx_ref[...]
    vH = vh_ref[...]

    Rk = rk_ref[...]          # (K, MK)   broadcast k -> every (m,k) lane group
    SM = sm_ref[...]          # (MK, MK)  sum over m, broadcast back
    Tk = tk_ref[...]          # (MK, M)   sum over k within each m group
    SN = sn_ref[...]          # (BN, BN)  per-batch sum over n, broadcast back

    def mm(a, b):
        # exact f32 selection-matrix matmul on the MXU
        return jnp.dot(a, b, preferred_element_type=jnp.float32,
                       precision=_HIGHEST)

    # broadcast Y / pilot mask from K lanes to the MK lane layout (MXU)
    Yb_r = mm(yr_ref[...], Rk)                    # (BN, MK)
    Yb_i = mm(yi_ref[...], Rk)
    pm_b = mm(pm_ref[...], Rk)

    # ---------------- Y_est / FN ----------------
    HXr = Hr * Xr - Hi * Xi
    HXi = Hr * Xi + Hi * Xr
    absH2 = Hr * Hr + Hi * Hi
    absX2 = Xr * Xr + Xi * Xi
    tmp = absH2 * vX + vH * (absX2 + vX)

    err_r = Yb_r - mm(HXr, SM) + HXr              # sum over M via MXU
    err_i = Yb_i - mm(HXi, SM) + HXi
    xi_y = mm(tmp, SM) - tmp + n0

    inv_xx = _recip(xi_y + vH)                    # 1 / xi_x
    inv_xh = _recip(xi_y + phi * vX)              # 1 / xi_h

    # ---------------- X (symbol) update: per-batch reduce over N -------------
    num_r = (Hr * err_r + Hi * err_i) * inv_xx    # real(conj(H)*err)/xi_x
    num_i = (Hr * err_i - Hi * err_r) * inv_xx    # imag(conj(H)*err)/xi_x
    var_x = _recip(mm(SN, absH2 * inv_xx))        # reduce+broadcast over n
    est_r = mm(SN, num_r) * var_x
    est_i = mm(SN, num_i) * var_x

    # QPSK soft demod (scaled by gamma)
    sc = SQRT2 / gamma                            # scalar path
    pr = jnp.tanh(sc * est_r)
    pi_ = jnp.tanh(sc * est_i)
    out_ref[:, XOFF + 0 * MK:XOFF + 1 * MK] = (INV_SQRT2 * pr) * pm_b
    out_ref[:, XOFF + 1 * MK:XOFF + 2 * MK] = (INV_SQRT2 * pi_) * pm_b
    out_ref[:, XOFF + 2 * MK:XOFF + 3 * MK] = (1.0 - 0.5 * (pr * pr + pi_ * pi_)) * pm_b

    # ---------------- H (channel) update: reduce over K (lane groups) --------
    mih = (alpha + (beta - alpha) * pm_b) * inv_xh          # mask / xi_h
    var_h = _recip(mm(mih * absX2, Tk))                     # (BN, M)
    est_hr = mm(mih * (Xr * err_r + Xi * err_i), Tk) * var_h
    est_hi = mm(mih * (Xr * err_i - Xi * err_r), Tk) * var_h
    g = phi * _recip(phi + var_h)                 # Gaussian-denoiser gain
    out_ref[:, 0 * M:1 * M] = g * est_hr
    out_ref[:, 1 * M:2 * M] = g * est_hi
    out_ref[:, 2 * M:3 * M] = g * var_h

    # zero the padding lanes of the lane-dense output slab
    if XOFF > 3 * M:
        out_ref[:, 3 * M:XOFF] = jnp.zeros((BN, XOFF - 3 * M), f32)
    tail = out_ref.shape[1] - (XOFF + 3 * MK)
    if tail > 0:
        out_ref[:, XOFF + 3 * MK:] = jnp.zeros((BN, tail), f32)


def bigabp_forward(Hr, Hi, Xr, Xi, vX, vH, Yr, Yi, pm3, params):
    """One BiGaBP last-iteration forward pass via a single-step Pallas kernel."""
    B, N, M, K = Hr.shape
    MK = M * K
    BN = B * N
    LH = 3 * M                                   # H-output lanes per (b, n)
    XOFF = ((LH + MK - 1) // MK) * MK            # X section start (group aligned)
    OUT_W = ((XOFF + 3 * MK + 127) // 128) * 128  # lane-dense, 128-multiple

    # ---- wrapper-side layout folding (pure XLA, outside the kernel) ----
    fold = lambda a: a.reshape(BN, MK)           # (B,N,M,K) -> (B*N, M*K)
    Hr2, Hi2, Xr2, Xi2, vX2, vH2 = (fold(a) for a in (Hr, Hi, Xr, Xi, vX, vH))
    Yr2 = Yr.reshape(BN, K)                      # untiled: broadcast in-kernel
    Yi2 = Yi.reshape(BN, K)
    pm2 = jnp.broadcast_to(pm3, (B, N, K)).reshape(BN, K)

    # ---- constant 0/1 selection matrices (MXU reductions / broadcasts) ----
    eyeK = jnp.eye(K, dtype=f32)
    Rk = jnp.tile(eyeK, (1, M))                            # (K, MK)
    SM = jnp.tile(eyeK, (M, M))                            # (MK, MK)
    Tk = jnp.repeat(jnp.eye(M, dtype=f32), K, axis=0)      # (MK, M)
    SN = jnp.repeat(jnp.repeat(jnp.eye(B, dtype=f32), N, axis=0), N, axis=1)  # (BN, BN)

    def _spec(shape):
        return pl.BlockSpec(shape, lambda i: (0,) * len(shape))

    in_specs = ([_spec((BN, MK))] * 6
                + [_spec((BN, K))] * 3
                + [_spec((K, MK)), _spec((MK, MK)), _spec((MK, M)),
                   _spec((BN, BN)),
                   pl.BlockSpec(memory_space=pltpu.MemorySpace.SMEM)])

    kernel = functools.partial(_bigabp_kernel, M=M, K=K, XOFF=XOFF)

    out = pl.pallas_call(
        kernel,
        grid=(1,),                               # single step: all batches at once
        in_specs=in_specs,
        out_specs=_spec((BN, OUT_W)),
        out_shape=jax.ShapeDtypeStruct((BN, OUT_W), f32),
        compiler_params=pltpu.CompilerParams(
            dimension_semantics=("arbitrary",)),
    )(Hr2, Hi2, Xr2, Xi2, vX2, vH2, Yr2, Yi2, pm2, Rk, SM, Tk, SN, params)

    # ---- wrapper-side split back into module output shapes ----
    out3 = out.reshape(B, N, OUT_W)
    Ho_r = out3[..., 0 * M:1 * M]                # (B, N, M)
    Ho_i = out3[..., 1 * M:2 * M]
    vHo = out3[..., 2 * M:3 * M]
    xrow = out3[:, 0, XOFF:XOFF + 3 * MK]        # X outputs replicated over n
    Xo_r = xrow[:, 0 * MK:1 * MK].reshape(B, M, K)
    Xo_i = xrow[:, 1 * MK:2 * MK].reshape(B, M, K)
    vXo = xrow[:, 2 * MK:3 * MK].reshape(B, M, K)
    return Xo_r, Xo_i, vXo, Ho_r, Ho_i, vHo


def bigabp_reference(Hr, Hi, Xr, Xi, vX, vH, Yr, Yi, pm3,
                     alpha, beta, gamma, phi, n0):
    """Pure-JAX reference (mirrors the torch forward with real/imag split)."""
    pm4 = pm3[:, :, None, :]                 # (B,1,1,K)
    mask = alpha * (1.0 - pm4) + beta * pm4
    HXr = Hr * Xr - Hi * Xi
    HXi = Hr * Xi + Hi * Xr
    err_r = Yr[:, :, None, :] - HXr.sum(2, keepdims=True) + HXr
    err_i = Yi[:, :, None, :] - HXi.sum(2, keepdims=True) + HXi
    absH2 = Hr ** 2 + Hi ** 2
    absX2 = Xr ** 2 + Xi ** 2
    tmp = absH2 * vX + vH * (absX2 + vX)
    xi_y = tmp.sum(2, keepdims=True) - tmp + n0
    xi_x = xi_y + vH
    xi_h = xi_y + phi * vX

    tr = Hr / xi_x
    ti = -Hi / xi_x
    var_x = 1.0 / (absH2 / xi_x).sum(1)
    est_r = (tr * err_r - ti * err_i).sum(1) * var_x
    est_i = (tr * err_i + ti * err_r).sum(1) * var_x
    pr = jnp.tanh(SQRT2 * est_r / gamma)
    pi_ = jnp.tanh(SQRT2 * est_i / gamma)
    est_post_r = pr / SQRT2
    est_post_i = pi_ / SQRT2
    var_post = 1.0 - 0.5 * (pr ** 2 + pi_ ** 2)
    Xo_r = est_post_r * pm3
    Xo_i = est_post_i * pm3
    vXo = var_post * pm3

    tr2 = mask * Xr / xi_h
    ti2 = -mask * Xi / xi_h
    var_h = 1.0 / (mask * absX2 / xi_h).sum(3)
    est_hr = (tr2 * err_r - ti2 * err_i).sum(3) * var_h
    est_hi = (tr2 * err_i + ti2 * err_r).sum(3) * var_h
    g = phi / (phi + var_h)
    return Xo_r, Xo_i, vXo, g * est_hr, g * est_hi, g * var_h


if __name__ == "__main__":
    # module hyper-parameters (deterministic init)
    bs, c, cp, k, kp = 2, 2, 1, 8, 2
    N, M = 4, 4                      # rx antennas, users
    B = bs * c
    alpha_init, beta_init, gamma_init = 0.9, 0.5, 1.0
    phi = 1.0
    N0 = 0.1

    # pilot mask: ones(c,1,1,k); [:cp,:,:,:kp]=0; repeat(bs,1,1,1)
    pm = jnp.ones((c, 1, 1, k), f32)
    pm = pm.at[:cp, :, :, :kp].set(0.0)
    pm = jnp.tile(pm, (bs, 1, 1, 1))          # (B,1,1,K)
    pm3 = pm[:, 0, :, :]                      # (B,1,K)

    key = jax.random.PRNGKey(0)
    ks = jax.random.split(key, 8)
    shape4 = (B, N, M, k)
    Hr = jax.random.normal(ks[0], shape4, f32)
    Hi = jax.random.normal(ks[1], shape4, f32)
    Xr = jax.random.normal(ks[2], shape4, f32)
    Xi = jax.random.normal(ks[3], shape4, f32)
    vX = jax.random.uniform(ks[4], shape4, f32, minval=0.1, maxval=1.0)
    vH = jax.random.uniform(ks[5], shape4, f32, minval=0.1, maxval=1.0)
    Yr = jax.random.normal(ks[6], (B, N, k), f32)
    Yi = jax.random.normal(ks[7], (B, N, k), f32)

    params = jnp.array([alpha_init, beta_init, gamma_init, phi, N0,
                        0.0, 0.0, 0.0], dtype=f32)

    outs = bigabp_forward(Hr, Hi, Xr, Xi, vX, vH, Yr, Yi, pm3, params)
    outs = jax.block_until_ready(outs)

    refs = bigabp_reference(Hr, Hi, Xr, Xi, vX, vH, Yr, Yi, pm3,
                            alpha_init, beta_init, gamma_init, phi, N0)
    for o, r in zip(outs, refs):
        np.testing.assert_allclose(np.asarray(o), np.asarray(r),
                                   rtol=1e-3, atol=1e-3)

    print("KERNEL_OK")
</pallas_src>

<mosaic_0001>
module attributes {stable_mosaic.version = 11 : i64} {
  func.func @_bigabp_kernel(%arg0: i32, %arg1: memref<16x32xf32, #tpu.memory_space<vmem>>, %arg2: memref<16x32xf32, #tpu.memory_space<vmem>>, %arg3: memref<16x32xf32, #tpu.memory_space<vmem>>, %arg4: memref<16x32xf32, #tpu.memory_space<vmem>>, %arg5: memref<16x32xf32, #tpu.memory_space<vmem>>, %arg6: memref<16x32xf32, #tpu.memory_space<vmem>>, %arg7: memref<16x8xf32, #tpu.memory_space<vmem>>, %arg8: memref<16x8xf32, #tpu.memory_space<vmem>>, %arg9: memref<16x8xf32, #tpu.memory_space<vmem>>, %arg10: memref<8x32xf32, #tpu.memory_space<vmem>>, %arg11: memref<32x32xf32, #tpu.memory_space<vmem>>, %arg12: memref<32x4xf32, #tpu.memory_space<vmem>>, %arg13: memref<16x16xf32, #tpu.memory_space<vmem>>, %arg14: memref<8xf32, #tpu.memory_space<smem>>, %arg15: memref<16x128xf32, #tpu.memory_space<vmem>>) attributes {dimension_semantics = [#tpu.dimension_semantics<arbitrary>], iteration_bounds = array<i64: 1>, scalar_prefetch = 0 : i64, scratch_operands = 0 : i64, tpu.core_type = #tpu.core_type<tc>, window_params = [{pipeline_mode = #tpu.pipeline_mode<synchronous>, transform_indices = @transform_0, window_bounds = array<i64: 16, 32>}, {pipeline_mode = #tpu.pipeline_mode<synchronous>, transform_indices = @transform_1, window_bounds = array<i64: 16, 32>}, {pipeline_mode = #tpu.pipeline_mode<synchronous>, transform_indices = @transform_2, window_bounds = array<i64: 16, 32>}, {pipeline_mode = #tpu.pipeline_mode<synchronous>, transform_indices = @transform_3, window_bounds = array<i64: 16, 32>}, {pipeline_mode = #tpu.pipeline_mode<synchronous>, transform_indices = @transform_4, window_bounds = array<i64: 16, 32>}, {pipeline_mode = #tpu.pipeline_mode<synchronous>, transform_indices = @transform_5, window_bounds = array<i64: 16, 32>}, {pipeline_mode = #tpu.pipeline_mode<synchronous>, transform_indices = @transform_6, window_bounds = array<i64: 16, 8>}, {pipeline_mode = #tpu.pipeline_mode<synchronous>, transform_indices = @transform_7, window_bounds = array<i64: 16, 8>}, {pipeline_mode = #tpu.pipeline_mode<synchronous>, transform_indices = @transform_8, window_bounds = array<i64: 16, 8>}, {pipeline_mode = #tpu.pipeline_mode<synchronous>, transform_indices = @transform_9, window_bounds = array<i64: 8, 32>}, {pipeline_mode = #tpu.pipeline_mode<synchronous>, transform_indices = @transform_10, window_bounds = array<i64: 32, 32>}, {pipeline_mode = #tpu.pipeline_mode<synchronous>, transform_indices = @transform_11, window_bounds = array<i64: 32, 4>}, {pipeline_mode = #tpu.pipeline_mode<synchronous>, transform_indices = @transform_12, window_bounds = array<i64: 16, 16>}, {transform_indices = @transform_13, window_bounds = array<i64: 8>}, {pipeline_mode = #tpu.pipeline_mode<synchronous>, transform_indices = @transform_14, window_bounds = array<i64: 16, 128>}]} {
    %c0 = arith.constant 0 : index
    %0 = memref.load %arg14[%c0] : memref<8xf32, #tpu.memory_space<smem>>
    %c1 = arith.constant 1 : index
    %1 = memref.load %arg14[%c1] : memref<8xf32, #tpu.memory_space<smem>>
    %c2 = arith.constant 2 : index
    %2 = memref.load %arg14[%c2] : memref<8xf32, #tpu.memory_space<smem>>
    %c3 = arith.constant 3 : index
    %3 = memref.load %arg14[%c3] : memref<8xf32, #tpu.memory_space<smem>>
    %c4 = arith.constant 4 : index
    %4 = memref.load %arg14[%c4] : memref<8xf32, #tpu.memory_space<smem>>
    %c0_0 = arith.constant 0 : index
    %c0_1 = arith.constant 0 : index
    %5 = vector.load %arg1[%c0_0, %c0_1] : memref<16x32xf32, #tpu.memory_space<vmem>>, vector<16x32xf32>
    %c0_2 = arith.constant 0 : index
    %c0_3 = arith.constant 0 : index
    %6 = vector.load %arg2[%c0_2, %c0_3] : memref<16x32xf32, #tpu.memory_space<vmem>>, vector<16x32xf32>
    %c0_4 = arith.constant 0 : index
    %c0_5 = arith.constant 0 : index
    %7 = vector.load %arg3[%c0_4, %c0_5] : memref<16x32xf32, #tpu.memory_space<vmem>>, vector<16x32xf32>
    %c0_6 = arith.constant 0 : index
    %c0_7 = arith.constant 0 : index
    %8 = vector.load %arg4[%c0_6, %c0_7] : memref<16x32xf32, #tpu.memory_space<vmem>>, vector<16x32xf32>
    %c0_8 = arith.constant 0 : index
    %c0_9 = arith.constant 0 : index
    %9 = vector.load %arg5[%c0_8, %c0_9] : memref<16x32xf32, #tpu.memory_space<vmem>>, vector<16x32xf32>
    %c0_10 = arith.constant 0 : index
    %c0_11 = arith.constant 0 : index
    %10 = vector.load %arg6[%c0_10, %c0_11] : memref<16x32xf32, #tpu.memory_space<vmem>>, vector<16x32xf32>
    %c0_12 = arith.constant 0 : index
    %c0_13 = arith.constant 0 : index
    %11 = vector.load %arg10[%c0_12, %c0_13] : memref<8x32xf32, #tpu.memory_space<vmem>>, vector<8x32xf32>
    %c0_14 = arith.constant 0 : index
    %c0_15 = arith.constant 0 : index
    %12 = vector.load %arg11[%c0_14, %c0_15] : memref<32x32xf32, #tpu.memory_space<vmem>>, vector<32x32xf32>
    %c0_16 = arith.constant 0 : index
    %c0_17 = arith.constant 0 : index
    %13 = vector.load %arg12[%c0_16, %c0_17] : memref<32x4xf32, #tpu.memory_space<vmem>>, vector<32x4xf32>
    %c0_18 = arith.constant 0 : index
    %c0_19 = arith.constant 0 : index
    %14 = vector.load %arg13[%c0_18, %c0_19] : memref<16x16xf32, #tpu.memory_space<vmem>>, vector<16x16xf32>
    %c0_20 = arith.constant 0 : index
    %c0_21 = arith.constant 0 : index
    %15 = vector.load %arg7[%c0_20, %c0_21] : memref<16x8xf32, #tpu.memory_space<vmem>>, vector<16x8xf32>
    %cst = arith.constant dense<0.000000e+00> : vector<16x32xf32>
    %16 = tpu.matmul %15, %11, %cst {dimension_numbers = #tpu.dot_dimension_numbers<[1], [0], [0], [1], [0, 0, 1, 1], [], []>, precision = #tpu.contract_precision<fp32>} : vector<16x8xf32>, vector<8x32xf32>, vector<16x32xf32> -> vector<16x32xf32>
    %c0_22 = arith.constant 0 : index
    %c0_23 = arith.constant 0 : index
    %17 = vector.load %arg8[%c0_22, %c0_23] : memref<16x8xf32, #tpu.memory_space<vmem>>, vector<16x8xf32>
    %cst_24 = arith.constant dense<0.000000e+00> : vector<16x32xf32>
    %18 = tpu.matmul %17, %11, %cst_24 {dimension_numbers = #tpu.dot_dimension_numbers<[1], [0], [0], [1], [0, 0, 1, 1], [], []>, precision = #tpu.contract_precision<fp32>} : vector<16x8xf32>, vector<8x32xf32>, vector<16x32xf32> -> vector<16x32xf32>
    %c0_25 = arith.constant 0 : index
    %c0_26 = arith.constant 0 : index
    %19 = vector.load %arg9[%c0_25, %c0_26] : memref<16x8xf32, #tpu.memory_space<vmem>>, vector<16x8xf32>
    %cst_27 = arith.constant dense<0.000000e+00> : vector<16x32xf32>
    %20 = tpu.matmul %19, %11, %cst_27 {dimension_numbers = #tpu.dot_dimension_numbers<[1], [0], [0], [1], [0, 0, 1, 1], [], []>, precision = #tpu.contract_precision<fp32>} : vector<16x8xf32>, vector<8x32xf32>, vector<16x32xf32> -> vector<16x32xf32>
    %21 = arith.mulf %5, %7 : vector<16x32xf32>
    %22 = arith.mulf %6, %8 : vector<16x32xf32>
    %23 = arith.subf %21, %22 : vector<16x32xf32>
    %24 = arith.mulf %5, %8 : vector<16x32xf32>
    %25 = arith.mulf %6, %7 : vector<16x32xf32>
    %26 = arith.addf %24, %25 : vector<16x32xf32>
    %27 = arith.mulf %5, %5 : vector<16x32xf32>
    %28 = arith.mulf %6, %6 : vector<16x32xf32>
    %29 = arith.addf %27, %28 : vector<16x32xf32>
    %30 = arith.mulf %7, %7 : vector<16x32xf32>
    %31 = arith.mulf %8, %8 : vector<16x32xf32>
    %32 = arith.addf %30, %31 : vector<16x32xf32>
    %33 = arith.mulf %29, %9 : vector<16x32xf32>
    %34 = arith.addf %32, %9 : vector<16x32xf32>
    %35 = arith.mulf %10, %34 : vector<16x32xf32>
    %36 = arith.addf %33, %35 : vector<16x32xf32>
    %cst_28 = arith.constant dense<0.000000e+00> : vector<16x32xf32>
    %37 = tpu.matmul %23, %12, %cst_28 {dimension_numbers = #tpu.dot_dimension_numbers<[1], [0], [0], [1], [0, 0, 1, 1], [], []>, precision = #tpu.contract_precision<fp32>} : vector<16x32xf32>, vector<32x32xf32>, vector<16x32xf32> -> vector<16x32xf32>
    %38 = arith.subf %16, %37 : vector<16x32xf32>
    %39 = arith.addf %38, %23 : vector<16x32xf32>
    %cst_29 = arith.constant dense<0.000000e+00> : vector<16x32xf32>
    %40 = tpu.matmul %26, %12, %cst_29 {dimension_numbers = #tpu.dot_dimension_numbers<[1], [0], [0], [1], [0, 0, 1, 1], [], []>, precision = #tpu.contract_precision<fp32>} : vector<16x32xf32>, vector<32x32xf32>, vector<16x32xf32> -> vector<16x32xf32>
    %41 = arith.subf %18, %40 : vector<16x32xf32>
    %42 = arith.addf %41, %26 : vector<16x32xf32>
    %cst_30 = arith.constant dense<0.000000e+00> : vector<16x32xf32>
    %43 = tpu.matmul %36, %12, %cst_30 {dimension_numbers = #tpu.dot_dimension_numbers<[1], [0], [0], [1], [0, 0, 1, 1], [], []>, precision = #tpu.contract_precision<fp32>} : vector<16x32xf32>, vector<32x32xf32>, vector<16x32xf32> -> vector<16x32xf32>
    %44 = arith.subf %43, %36 : vector<16x32xf32>
    %45 = vector.broadcast %4 : f32 to vector<16x32xf32>
    %46 = arith.addf %44, %45 : vector<16x32xf32>
    %47 = arith.addf %46, %10 : vector<16x32xf32>
    %48 = tpu.reciprocal %47 {approx = true} : vector<16x32xf32> -> vector<16x32xf32>
    %49 = arith.mulf %47, %48 : vector<16x32xf32>
    %cst_31 = arith.constant 2.000000e+00 : f32
    %50 = vector.broadcast %cst_31 : f32 to vector<16x32xf32>
    %51 = arith.subf %50, %49 : vector<16x32xf32>
    %52 = arith.mulf %48, %51 : vector<16x32xf32>
    %53 = vector.broadcast %3 : f32 to vector<16x32xf32>
    %54 = arith.mulf %53, %9 : vector<16x32xf32>
    %55 = arith.addf %46, %54 : vector<16x32xf32>
    %56 = tpu.reciprocal %55 {approx = true} : vector<16x32xf32> -> vector<16x32xf32>
    %57 = arith.mulf %55, %56 : vector<16x32xf32>
    %cst_32 = arith.constant 2.000000e+00 : f32
    %58 = vector.broadcast %cst_32 : f32 to vector<16x32xf32>
    %59 = arith.subf %58, %57 : vector<16x32xf32>
    %60 = arith.mulf %56, %59 : vector<16x32xf32>
    %61 = arith.mulf %5, %39 : vector<16x32xf32>
    %62 = arith.mulf %6, %42 : vector<16x32xf32>
    %63 = arith.addf %61, %62 : vector<16x32xf32>
    %64 = arith.mulf %63, %52 : vector<16x32xf32>
    %65 = arith.mulf %5, %42 : vector<16x32xf32>
    %66 = arith.mulf %6, %39 : vector<16x32xf32>
    %67 = arith.subf %65, %66 : vector<16x32xf32>
    %68 = arith.mulf %67, %52 : vector<16x32xf32>
    %69 = arith.mulf %29, %52 : vector<16x32xf32>
    %cst_33 = arith.constant dense<0.000000e+00> : vector<16x32xf32>
    %70 = tpu.matmul %14, %69, %cst_33 {dimension_numbers = #tpu.dot_dimension_numbers<[1], [0], [0], [1], [0, 0, 1, 1], [], []>, precision = #tpu.contract_precision<fp32>} : vector<16x16xf32>, vector<16x32xf32>, vector<16x32xf32> -> vector<16x32xf32>
    %71 = tpu.reciprocal %70 {approx = true} : vector<16x32xf32> -> vector<16x32xf32>
    %72 = arith.mulf %70, %71 : vector<16x32xf32>
    %cst_34 = arith.constant 2.000000e+00 : f32
    %73 = vector.broadcast %cst_34 : f32 to vector<16x32xf32>
    %74 = arith.subf %73, %72 : vector<16x32xf32>
    %75 = arith.mulf %71, %74 : vector<16x32xf32>
    %cst_35 = arith.constant dense<0.000000e+00> : vector<16x32xf32>
    %76 = tpu.matmul %14, %64, %cst_35 {dimension_numbers = #tpu.dot_dimension_numbers<[1], [0], [0], [1], [0, 0, 1, 1], [], []>, precision = #tpu.contract_precision<fp32>} : vector<16x16xf32>, vector<16x32xf32>, vector<16x32xf32> -> vector<16x32xf32>
    %77 = arith.mulf %76, %75 : vector<16x32xf32>
    %cst_36 = arith.constant dense<0.000000e+00> : vector<16x32xf32>
    %78 = tpu.matmul %14, %68, %cst_36 {dimension_numbers = #tpu.dot_dimension_numbers<[1], [0], [0], [1], [0, 0, 1, 1], [], []>, precision = #tpu.contract_precision<fp32>} : vector<16x16xf32>, vector<16x32xf32>, vector<16x32xf32> -> vector<16x32xf32>
    %79 = arith.mulf %78, %75 : vector<16x32xf32>
    %cst_37 = arith.constant 1.41421354 : f32
    %80 = arith.divf %cst_37, %2 : f32
    %81 = vector.broadcast %80 : f32 to vector<16x32xf32>
    %82 = arith.mulf %81, %77 : vector<16x32xf32>
    %83 = math.tanh %82 : vector<16x32xf32>
    %84 = vector.broadcast %80 : f32 to vector<16x32xf32>
    %85 = arith.mulf %84, %79 : vector<16x32xf32>
    %86 = math.tanh %85 : vector<16x32xf32>
    %cst_38 = arith.constant 0.707106769 : f32
    %87 = vector.broadcast %cst_38 : f32 to vector<16x32xf32>
    %88 = arith.mulf %87, %83 : vector<16x32xf32>
    %89 = arith.mulf %88, %20 : vector<16x32xf32>
    %c0_39 = arith.constant 0 : index
    %c32 = arith.constant 32 : index
    %90 = vector.load %arg15[%c0_39, %c32] : memref<16x128xf32, #tpu.memory_space<vmem>>, vector<16x32xf32>
    tpu.vector_store %arg15[%c0_39, %c32], %89 {strides = array<i32>} : memref<16x128xf32, #tpu.memory_space<vmem>>, vector<16x32xf32>,
    %cst_40 = arith.constant 0.707106769 : f32
    %91 = vector.broadcast %cst_40 : f32 to vector<16x32xf32>
    %92 = arith.mulf %91, %86 : vector<16x32xf32>
    %93 = arith.mulf %92, %20 : vector<16x32xf32>
    %c0_41 = arith.constant 0 : index
    %c64 = arith.constant 64 : index
    %94 = vector.load %arg15[%c0_41, %c64] : memref<16x128xf32, #tpu.memory_space<vmem>>, vector<16x32xf32>
    tpu.vector_store %arg15[%c0_41, %c64], %93 {strides = array<i32>} : memref<16x128xf32, #tpu.memory_space<vmem>>, vector<16x32xf32>,
    %95 = arith.mulf %83, %83 : vector<16x32xf32>
    %96 = arith.mulf %86, %86 : vector<16x32xf32>
    %97 = arith.addf %95, %96 : vector<16x32xf32>
    %cst_42 = arith.constant 5.000000e-01 : f32
    %98 = vector.broadcast %cst_42 : f32 to vector<16x32xf32>
    %99 = arith.mulf %98, %97 : vector<16x32xf32>
    %cst_43 = arith.constant 1.000000e+00 : f32
    %100 = vector.broadcast %cst_43 : f32 to vector<16x32xf32>
    %101 = arith.subf %100, %99 : vector<16x32xf32>
    %102 = arith.mulf %101, %20 : vector<16x32xf32>
    %c0_44 = arith.constant 0 : index
    %c96 = arith.constant 96 : index
    %103 = vector.load %arg15[%c0_44, %c96] : memref<16x128xf32, #tpu.memory_space<vmem>>, vector<16x32xf32>
    tpu.vector_store %arg15[%c0_44, %c96], %102 {strides = array<i32>} : memref<16x128xf32, #tpu.memory_space<vmem>>, vector<16x32xf32>,
    %104 = arith.subf %1, %0 : f32
    %105 = vector.broadcast %104 : f32 to vector<16x32xf32>
    %106 = arith.mulf %105, %20 : vector<16x32xf32>
    %107 = vector.broadcast %0 : f32 to vector<16x32xf32>
    %108 = arith.addf %107, %106 : vector<16x32xf32>
    %109 = arith.mulf %108, %60 : vector<16x32xf32>
    %110 = arith.mulf %109, %32 : vector<16x32xf32>
    %cst_45 = arith.constant dense<0.000000e+00> : vector<16x4xf32>
    %111 = tpu.matmul %110, %13, %cst_45 {dimension_numbers = #tpu.dot_dimension_numbers<[1], [0], [0], [1], [0, 0, 1, 1], [], []>, precision = #tpu.contract_precision<fp32>} : vector<16x32xf32>, vector<32x4xf32>, vector<16x4xf32> -> vector<16x4xf32>
    %112 = tpu.reciprocal %111 {approx = true} : vector<16x4xf32> -> vector<16x4xf32>
    %113 = arith.mulf %111, %112 : vector<16x4xf32>
    %cst_46 = arith.constant 2.000000e+00 : f32
    %114 = vector.broadcast %cst_46 : f32 to vector<16x4xf32>
    %115 = arith.subf %114, %113 : vector<16x4xf32>
    %116 = arith.mulf %112, %115 : vector<16x4xf32>
    %117 = arith.mulf %7, %39 : vector<16x32xf32>
    %118 = arith.mulf %8, %42 : vector<16x32xf32>
    %119 = arith.addf %117, %118 : vector<16x32xf32>
    %120 = arith.mulf %109, %119 : vector<16x32xf32>
    %cst_47 = arith.constant dense<0.000000e+00> : vector<16x4xf32>
    %121 = tpu.matmul %120, %13, %cst_47 {dimension_numbers = #tpu.dot_dimension_numbers<[1], [0], [0], [1], [0, 0, 1, 1], [], []>, precision = #tpu.contract_precision<fp32>} : vector<16x32xf32>, vector<32x4xf32>, vector<16x4xf32> -> vector<16x4xf32>
    %122 = arith.mulf %121, %116 : vector<16x4xf32>
    %123 = arith.mulf %7, %42 : vector<16x32xf32>
    %124 = arith.mulf %8, %39 : vector<16x32xf32>
    %125 = arith.subf %123, %124 : vector<16x32xf32>
    %126 = arith.mulf %109, %125 : vector<16x32xf32>
    %cst_48 = arith.constant dense<0.000000e+00> : vector<16x4xf32>
    %127 = tpu.matmul %126, %13, %cst_48 {dimension_numbers = #tpu.dot_dimension_numbers<[1], [0], [0], [1], [0, 0, 1, 1], [], []>, precision = #tpu.contract_precision<fp32>} : vector<16x32xf32>, vector<32x4xf32>, vector<16x4xf32> -> vector<16x4xf32>
    %128 = arith.mulf %127, %116 : vector<16x4xf32>
    %129 = vector.broadcast %3 : f32 to vector<16x4xf32>
    %130 = arith.addf %129, %116 : vector<16x4xf32>
    %131 = tpu.reciprocal %130 {approx = true} : vector<16x4xf32> -> vector<16x4xf32>
    %132 = arith.mulf %130, %131 : vector<16x4xf32>
    %cst_49 = arith.constant 2.000000e+00 : f32
    %133 = vector.broadcast %cst_49 : f32 to vector<16x4xf32>
    %134 = arith.subf %133, %132 : vector<16x4xf32>
    %135 = arith.mulf %131, %134 : vector<16x4xf32>
    %136 = vector.broadcast %3 : f32 to vector<16x4xf32>
    %137 = arith.mulf %136, %135 : vector<16x4xf32>
    %138 = arith.mulf %137, %122 : vector<16x4xf32>
    %c0_50 = arith.constant 0 : index
    %c0_51 = arith.constant 0 : index
    %139 = vector.load %arg15[%c0_50, %c0_51] : memref<16x128xf32, #tpu.memory_space<vmem>>, vector<16x4xf32>
    tpu.vector_store %arg15[%c0_50, %c0_51], %138 {strides = array<i32>} : memref<16x128xf32, #tpu.memory_space<vmem>>, vector<16x4xf32>,
    %140 = arith.mulf %137, %128 : vector<16x4xf32>
    %c0_52 = arith.constant 0 : index
    %c4_53 = arith.constant 4 : index
    %141 = vector.load %arg15[%c0_52, %c4_53] : memref<16x128xf32, #tpu.memory_space<vmem>>, vector<16x4xf32>
    tpu.vector_store %arg15[%c0_52, %c4_53], %140 {strides = array<i32>} : memref<16x128xf32, #tpu.memory_space<vmem>>, vector<16x4xf32>,
    %142 = arith.mulf %137, %116 : vector<16x4xf32>
    %c0_54 = arith.constant 0 : index
    %c8 = arith.constant 8 : index
    %143 = vector.load %arg15[%c0_54, %c8] : memref<16x128xf32, #tpu.memory_space<vmem>>, vector<16x4xf32>
    tpu.vector_store %arg15[%c0_54, %c8], %142 {strides = array<i32>} : memref<16x128xf32, #tpu.memory_space<vmem>>, vector<16x4xf32>,
    %cst_55 = arith.constant 0.000000e+00 : f32
    %144 = vector.broadcast %cst_55 : f32 to vector<16x20xf32>
    %c0_56 = arith.constant 0 : index
    %c12 = arith.constant 12 : index
    %145 = vector.load %arg15[%c0_56, %c12] : memref<16x128xf32, #tpu.memory_space<vmem>>, vector<16x20xf32>
    tpu.vector_store %arg15[%c0_56, %c12], %144 {strides = array<i32>} : memref<16x128xf32, #tpu.memory_space<vmem>>, vector<16x20xf32>,
    return
  }
  func.func @transform_0(%arg0: i32) -> (i32, i32) {
    %c0_i32 = arith.constant 0 : i32
    %c0_i32_0 = arith.constant 0 : i32
    %c0_i32_1 = arith.constant 0 : i32
    return %c0_i32, %c0_i32_0 : i32, i32
  }
  func.func @transform_1(%arg0: i32) -> (i32, i32) {
    %c0_i32 = arith.constant 0 : i32
    %c0_i32_0 = arith.constant 0 : i32
    %c0_i32_1 = arith.constant 0 : i32
    return %c0_i32, %c0_i32_0 : i32, i32
  }
  func.func @transform_2(%arg0: i32) -> (i32, i32) {
    %c0_i32 = arith.constant 0 : i32
    %c0_i32_0 = arith.constant 0 : i32
    %c0_i32_1 = arith.constant 0 : i32
    return %c0_i32, %c0_i32_0 : i32, i32
  }
  func.func @transform_3(%arg0: i32) -> (i32, i32) {
    %c0_i32 = arith.constant 0 : i32
    %c0_i32_0 = arith.constant 0 : i32
    %c0_i32_1 = arith.constant 0 : i32
    return %c0_i32, %c0_i32_0 : i32, i32
  }
  func.func @transform_4(%arg0: i32) -> (i32, i32) {
    %c0_i32 = arith.constant 0 : i32
    %c0_i32_0 = arith.constant 0 : i32
    %c0_i32_1 = arith.constant 0 : i32
    return %c0_i32, %c0_i32_0 : i32, i32
  }
  func.func @transform_5(%arg0: i32) -> (i32, i32) {
    %c0_i32 = arith.constant 0 : i32
    %c0_i32_0 = arith.constant 0 : i32
    %c0_i32_1 = arith.constant 0 : i32
    return %c0_i32, %c0_i32_0 : i32, i32
  }
  func.func @transform_6(%arg0: i32) -> (i32, i32) {
    %c0_i32 = arith.constant 0 : i32
    %c0_i32_0 = arith.constant 0 : i32
    %c0_i32_1 = arith.constant 0 : i32
    return %c0_i32, %c0_i32_0 : i32, i32
  }
  func.func @transform_7(%arg0: i32) -> (i32, i32) {
    %c0_i32 = arith.constant 0 : i32
    %c0_i32_0 = arith.constant 0 : i32
    %c0_i32_1 = arith.constant 0 : i32
    return %c0_i32, %c0_i32_0 : i32, i32
  }
  func.func @transform_8(%arg0: i32) -> (i32, i32) {
    %c0_i32 = arith.constant 0 : i32
    %c0_i32_0 = arith.constant 0 : i32
    %c0_i32_1 = arith.constant 0 : i32
    return %c0_i32, %c0_i32_0 : i32, i32
  }
  func.func @transform_9(%arg0: i32) -> (i32, i32) {
    %c0_i32 = arith.constant 0 : i32
    %c0_i32_0 = arith.constant 0 : i32
    %c0_i32_1 = arith.constant 0 : i32
    return %c0_i32, %c0_i32_0 : i32, i32
  }
  func.func @transform_10(%arg0: i32) -> (i32, i32) {
    %c0_i32 = arith.constant 0 : i32
    %c0_i32_0 = arith.constant 0 : i32
    %c0_i32_1 = arith.constant 0 : i32
    return %c0_i32, %c0_i32_0 : i32, i32
  }
  func.func @transform_11(%arg0: i32) -> (i32, i32) {
    %c0_i32 = arith.constant 0 : i32
    %c0_i32_0 = arith.constant 0 : i32
    %c0_i32_1 = arith.constant 0 : i32
    return %c0_i32, %c0_i32_0 : i32, i32
  }
  func.func @transform_12(%arg0: i32) -> (i32, i32) {
    %c0_i32 = arith.constant 0 : i32
    %c0_i32_0 = arith.constant 0 : i32
    %c0_i32_1 = arith.constant 0 : i32
    return %c0_i32, %c0_i32_0 : i32, i32
  }
  func.func @transform_13(%arg0: i32) -> i32 {
    %c0_i32 = arith.constant 0 : i32
    %c0_i32_0 = arith.constant 0 : i32
    return %c0_i32 : i32
  }
  func.func @transform_14(%arg0: i32) -> (i32, i32) {
    %c0_i32 = arith.constant 0 : i32
    %c0_i32_0 = arith.constant 0 : i32
    %c0_i32_1 = arith.constant 0 : i32
    return %c0_i32, %c0_i32_0 : i32, i32
  }
}

</mosaic_0001>

<bundles_post_ra>
// kernel: tpu_custom_call.1
= control target key start
LH: loop header
LB: loop body
LE: loop exit
PB: predicated region body
PF: predicated region fallthrough
CT: control target
= control target key end

     0   :  { %s9159_s0 = inlined_call_operand.vmem [shape: f32[16,32], index: 0, kind: input, shape index: {}]   ;;  %s9160_s1 = inlined_call_operand.vmem [shape: f32[16,32], index: 1, kind: input, shape index: {}]   ;;  %s9161_s2 = inlined_call_operand.vmem [shape: f32[16,32], index: 2, kind: input, shape index: {}]   ;;  %s9162_s3 = inlined_call_operand.vmem [shape: f32[16,32], index: 3, kind: input, shape index: {}]   ;;  %s9163_s4 = inlined_call_operand.vmem [shape: f32[16,32], index: 4, kind: input, shape index: {}]   ;;  %s9164_s5 = inlined_call_operand.hbm [shape: f32[16,32], index: 5, kind: input, shape index: {}]   ;;  %s9165_s6 = inlined_call_operand.vmem [shape: f32[16,8], index: 6, kind: input, shape index: {}]   ;;  %s9166_s7 = inlined_call_operand.vmem [shape: f32[16,8], index: 7, kind: input, shape index: {}]   ;;  %s9167_s8 = inlined_call_operand.vmem [shape: f32[16,8], index: 8, kind: input, shape index: {}]   ;;  %s9168_s9 = inlined_call_operand.hbm [shape: f32[8,32], index: 9, kind: input, shape index: {}]   ;;  %s9169_s10 = inlined_call_operand.vmem [shape: f32[32,32], index: 10, kind: input, shape index: {}]   ;;  %s9170_s11 = inlined_call_operand.vmem [shape: f32[32,4], index: 11, kind: input, shape index: {}]   ;;  %s9171_s12 = inlined_call_operand.vmem [shape: f32[16,16], index: 12, kind: input, shape index: {}]   ;;  %s9172_s13 = inlined_call_operand.vmem [shape: f32[8], index: 13, kind: input, shape index: {}]   ;;  %s9173_s14 = inlined_call_operand.hbm [shape: f32[16,128], index: 14, kind: output, shape index: {}]  }
   0x1   :  { %9175 = sst [smem:[#allocation14_spill]] %s9173_s14 }
   0x2   :  { %19 = vsyncpa [#allocation3], 0 }
   0x3   :  { %20 = vsyncpa [#allocation7], 0 }
   0x4   :  { %21 = vsyncpa [#allocation5], 0 }
   0x5   :  { %22 = vsyncpa [#allocation4], 0  ;;  %s8160_s29 = smov [#allocation2]   ;;  %s8074_s17 = scalar_lea.hbm %s9164_s5, 256 }
   0x6   :  { %s38_s30 = sshll.u32 %s8160_s29, 4  ;;  %p8075_p0 = scmp.ne.s32.totalorder %s9164_s5, %s8074_s17  ;;  %s39_s30 = int_to_ptr.vmem [resolvable:$true] %s38_s30 }
   0x7   :  { %p8078_p1 = scmp.lt.u32.totalorder %s8074_s17, %s9164_s5 }
   0x9   :  { %p8080_p2 = pnand %p8078_p1, %p8075_p0 }
   0xb   :  { %8083 = shalt.err (!%p8080_p2)
}
   0xc   :  { %s8084_s22 = scalar_lea.vmem %s39_s30, 256  ;;  %p8089_p4 = scmp.lt.s32.totalorder %s39_s30, %s39_s30 }
   0xd   :  { %p8085_p3 = scmp.ne.s32.totalorder %s39_s30, %s8084_s22  ;;  %p8090_p5 = scmp.lt.s32.totalorder %s8084_s22, %s8084_s22 }
   0xf   :  { %p8091_p6 = por %p8090_p5, %p8089_p4 }
  0x11   :  { %p8092_p7 = pnand %p8091_p6, %p8085_p3 }
  0x13   :  { %8095 = shalt.err (!%p8092_p7)
}
  0x14   :  { %s8161_s23 = smov 128   ;;  %s8162_s24 = smov 8  }
  0x15   :  { %44 = dma.hbm_to_vmem [thread:$0]  %s9164_s5, 256, %s39_s30, [#allocation3], %s8161_s23, %s8161_s23, %s8162_s24  }
  0x16   :  { %s8163_s27 = smov [#allocation6]   ;;  %s73_s16 = sshll.u32 %s9172_s13, 4  ;;  %s74_s16 = int_to_ptr.vmem [resolvable:$true] %s73_s16 }
  0x17   :  { %s57_s28 = sshll.u32 %s8163_s27, 4  ;;  %s8096_s19 = scalar_lea.hbm %s9168_s9, 128  ;;  %s58_s28 = int_to_ptr.vmem [resolvable:$true] %s57_s28 }
  0x18   :  { %p8097_p8 = scmp.ne.s32.totalorder %s9168_s9, %s8096_s19  ;;  %p8100_p9 = scmp.lt.u32.totalorder %s8096_s19, %s9168_s9 }
  0x1a   :  { %p8102_p10 = pnand %p8100_p9, %p8097_p8 }
  0x1c   :  { %8105 = shalt.err (!%p8102_p10)
}
  0x1d   :  { %s8106_s5 = scalar_lea.vmem %s58_s28, 128  ;;  %p8111_p12 = scmp.lt.s32.totalorder %s58_s28, %s58_s28 }
  0x1e   :  { %p8107_p11 = scmp.ne.s32.totalorder %s58_s28, %s8106_s5  ;;  %p8112_p13 = scmp.lt.s32.totalorder %s8106_s5, %s8106_s5 }
  0x20   :  { %p8113_p0 = por %p8112_p13, %p8111_p12 }
  0x22   :  { %p8114_p1 = pnand %p8113_p0, %p8107_p11 }
  0x24   :  { %8117 = shalt.err (!%p8114_p1)
}
  0x25   :  { %60 = dma.hbm_to_vmem [thread:$0]  %s9168_s9, 128, %s58_s28, [#allocation7]  }
  0x26   :  { %s8118_s25 = scalar_lea.vmem %s74_s16, 16  ;;  %p8123_p3 = scmp.lt.s32.totalorder %s74_s16, %s74_s16 }
  0x27   :  { %p8119_p2 = scmp.ne.s32.totalorder %s74_s16, %s8118_s25  ;;  %p8124_p4 = scmp.lt.s32.totalorder %s8118_s25, %s8118_s25 }
  0x29   :  { %p8125_p5 = por %p8124_p4, %p8123_p3 }
  0x2b   :  { %p8126_p6 = pnand %p8125_p5, %p8119_p2 }
  0x2d   :  { %8129 = shalt.err (!%p8126_p6)
}
  0x2e   :  { %s8164_s14 = smov [#allocation8]  }
  0x2f   :  { %76 = dma.vmem_to_smem %s74_s16, 16, %s8164_s14, [#allocation5]  }
  0x30   :  { %8152 = dma.done.wait [#allocation3], 256  }
  0x31   :  { %8153 = vsyncadd [#allocation3], 4294967040 }
  0x32   :  { %8154 = dma.done.wait [#allocation7], 128  }
  0x33   :  { %8155 = vsyncadd [#allocation7], 4294967168 }
  0x34   :  { %8156 = dma.done.wait [#allocation5], 16  }
  0x35   :  { %8157 = vsyncadd [#allocation5], 4294967280 }
  0x36   :  { %86 = sfence }
  0x37   :  { %v104_v0 = vld [vmem:[#allocation6] sm:$0xff]  ;;  %vm117_vm0 = vcmask 64512   ;;  %v613_v1 = vld [vmem:[%s9166_s7] sm:$0xff]  ;;  %v614_v2 = vld [vmem:[%s9166_s7 + $0x8] sm:$0xff]  ;;  %vm1639_vm1 = vcmask 261120   ;;  %vm3296_vm2 = vcmask 130048  }
  0x38   :  { %v8282_v3 = vand.u32 4294901760, %v104_v0  ;;  %v616_v4 = vsel %vm117_vm0, %v613_v1, 0  ;;  %v619_v5 = vsel %vm117_vm0, %v614_v2, 0  ;;  %v115_v6 = vld [vmem:[%s9165_s6] sm:$0xff]  ;;  %v116_v7 = vld [vmem:[%s9165_s6 + $0x8] sm:$0xff]  ;;  %v107_v58 = vld [vmem:[%s9169_s10 + $0x10] sm:$0xff] }
  0x39   :  { %v8292_v8 = vand.u32 4294901760, %v616_v4  ;;  %v8294_v9 = vand.u32 4294901760, %v619_v5  ;;  %v119_v10 = vsel %vm117_vm0, %v115_v6, 0  ;;  %v122_v11 = vsel %vm117_vm0, %v116_v7, 0  ;;  %v8343_v34 = vld [vmem:[%s9159_s0] sm:$0xff]  ;;  %v8373_v40 = vld [vmem:[%s9159_s0 + $0x8] sm:$0xff] }
  0x3a   :  { %6969 = vmatprep.subr.mxu1 %v8282_v3  ;;  %6939 = vmatprep.subr.mxu0 %v8282_v3  ;;  %v8300_v12 = vand.u32 4294901760, %v119_v10  ;;  %v8302_v13 = vand.u32 4294901760, %v122_v11  ;;  %v8305_v14 = vsub.f32 %v104_v0, %v8282_v3  ;;  %v8349_v35 = vld [vmem:[%s9160_s1] sm:$0xff]  ;;  %v8378_v41 = vld [vmem:[%s9160_s1 + $0x8] sm:$0xff]  ;;  %v108_v59 = vld [vmem:[%s9169_s10 + $0x18] sm:$0xff]  ;;  %v1653_v0 = vand.u32 4294901760, %v107_v58 }
  0x3b   :  { %6970 = vmatpush3.msra.mxu1 %v8282_v3  ;;  %v688_v15 = vsub.f32 %v616_v4, %v8292_v8  ;;  %v8310_v16 = vsub.f32 %v619_v5, %v8294_v9  ;;  %6940 = vmatpush3.msra.mxu0 %v8282_v3  ;;  %v8354_v36 = vld [vmem:[%s9161_s2] sm:$0xff]  ;;  %v8383_v42 = vld [vmem:[%s9161_s2 + $0x8] sm:$0xff]  ;;  %v1656_v1 = vand.u32 4294901760, %v108_v59  ;;  %s6595_s5 = sld [smem:[#allocation8 + $0x3]]  ;;  %s6596_s13 = sld [smem:[#allocation8 + $0x4]]  ;;  %vm4846_vm3 = vcmask 523520  }
  0x3c   :  { %v191_v17 = vsub.f32 %v119_v10, %v8300_v12  ;;  %v8315_v18 = vsub.f32 %v122_v11, %v8302_v13  ;;  %v8318_v19 = vand.u32 4294901760, %v8305_v14  ;;  %v8359_v37 = vld [vmem:[%s9162_s3] sm:$0xff]  ;;  %v1607_v38 = vmul.f32 %v8354_v36, %v8343_v34  ;;  %v8388_v43 = vld [vmem:[%s9162_s3 + $0x8] sm:$0xff]  ;;  %s8820_s30 = sld [smem:[#allocation8]]  ;;  %s6593_s25 = sld [smem:[#allocation8 + $0x1]] }
  0x3d   :  { %v689_v20 = vand.u32 4294901760, %v688_v15  ;;  %v699_v21 = vand.u32 4294901760, %v8310_v16  ;;  %v1609_v39 = vmul.f32 %v8359_v37, %v8349_v35  ;;  %v1110_v45 = vld [vmem:[%s9167_s8] sm:$0xff]  ;;  %v1608_v46 = vmul.f32 %v8383_v42, %v8373_v40  ;;  %v106_v49 = vld [vmem:[%s9169_s10 + $0x8] sm:$0xff]  ;;  %s8165_s17 = smov 64   ;;  %s8166_s6 = smov 32  }
  0x3e   :  { %v192_v22 = vand.u32 4294901760, %v191_v17  ;;  %v202_v23 = vand.u32 4294901760, %v8315_v18  ;;  %v214_v24 = vsub.f32 %v8305_v14, %v8318_v19  ;;  %v1610_v47 = vmul.f32 %v8388_v43, %v8378_v41  ;;  %v105_v48 = vld [vmem:[%s9169_s10] sm:$0xff]  ;;  %v1111_v51 = vld [vmem:[%s9167_s8 + $0x8] sm:$0xff]  ;;  %s8167_s7 = smov 96   ;;  %s8168_s18 = smov 4  }
  0x3f   :  { %v690_v25 = vsub.f32 %v688_v15, %v689_v20  ;;  %v700_v26 = vsub.f32 %v8310_v16, %v699_v21  ;;  %v8390_v44 = vsub.f32 %v1607_v38, %v1609_v39  ;;  %v1113_v52 = vsel %vm117_vm0, %v1110_v45, 0  ;;  %s8169_s19 = smov [#allocation9]  }
  0x40   :  { %v193_v27 = vsub.f32 %v191_v17, %v192_v22  ;;  %v203_v28 = vsub.f32 %v8315_v18, %v202_v23  ;;  %v8330_v29 = vand.u32 4294901760, %v214_v24  ;;  %v1647_v53 = vand.u32 4294901760, %v105_v48  ;;  %s6579_s8 = sshll.u32 %s8169_s19, 4  ;;  %s6580_s8 = int_to_ptr.vmem [resolvable:$true] %s6579_s8 }
  0x41   :  { %v691_v30 = vand.u32 4294901760, %v690_v25  ;;  %v701_v31 = vand.u32 4294901760, %v700_v26  ;;  %v1641_v50 = vsel %vm1639_vm1, %v8390_v44, 0  ;;  %v8417_v54 = vsub.f32 %v1608_v46, %v1610_v47  ;;  %s8130_s10 = scalar_lea.vmem %s6580_s8, 256  ;;  %p8135_p8 = scmp.lt.s32.totalorder %s6580_s8, %s6580_s8 }
  0x42   :  { %v194_v32 = vand.u32 4294901760, %v193_v27  ;;  %v204_v33 = vand.u32 4294901760, %v203_v28  ;;  %6974 = vmatprep.subr.mxu1 %v8330_v29  ;;  %6944 = vmatprep.subr.mxu0 %v8330_v29  ;;  %v1650_v55 = vand.u32 4294901760, %v106_v49  ;;  %v8419_v56 = vand.u32 4294901760, %v1641_v50  ;;  %s4887_s9 = ssub.f32 %s6593_s25, %s8820_s30  ;;  %p8131_p7 = scmp.ne.s32.totalorder %s6580_s8, %s8130_s10 }
  0x43   :  { %6971 = vmatprep.mubr.f32.mxu1 %v691_v30  ;;  %v1116_v57 = vsel %vm117_vm0, %v1111_v51, 0  ;;  %v8428_v60 = vand.u32 4294901760, %v1113_v52  ;;  %v1644_v61 = vsel %vm1639_vm1, %v8417_v54, 0  ;;  %v8437_v62 = vsub.f32 %v105_v48, %v1647_v53  ;;  %p8136_p9 = scmp.lt.s32.totalorder %s8130_s10, %s8130_s10 }
  0x44   :  { %6972 = vmatmul.mubr.f32.vlgmr.msra.gmra.mrb[0].mxu1 %v701_v31  ;;  %6941 = vmatprep.mubr.f32.mxu0 %v194_v32  ;;  %v8439_v63 = vand.u32 4294901760, %v1116_v57  ;;  %v8444_v2 = vsub.f32 %v1641_v50, %v8419_v56  ;;  %v8446_v4 = vsub.f32 %v106_v49, %v1650_v55  ;;  %v8454_v6 = vand.u32 4294901760, %v1644_v61 }
  0x45   :  { %6942 = vmatmul.mubr.f32.vlgmr.msra.gmra.mrb[0].mxu0 %v204_v33  ;;  %6975 = vmatpush3.msra.mxu1 %v8330_v29  ;;  %v8451_v5 = vsub.f32 %v1113_v52, %v8428_v60  ;;  %v8456_v7 = vpack.c.bf16 %v1650_v55, %v1647_v53  ;;  %v1738_v10 = vand.u32 4294901760, %v8437_v62  ;;  %v8496_v30 = vpack.c.bf16 %v1656_v1, %v1653_v0  ;;  %p8137_p10 = por %p8136_p9, %p8135_p8 }
  0x46   :  { %6976 = vmatprep.mubr.f32.mxu1 %v8292_v8  ;;  %6945 = vmatpush3.msra.mxu0 %v8330_v29  ;;  %v8460_v11 = vsub.f32 %v1116_v57, %v8439_v63  ;;  %v8530_v51 = vpack.c.bf16 %v8446_v4, %v8437_v62  ;;  %v1613_v52 = vmul.f32 %v8359_v37, %v8343_v34  ;;  %vm4861_vm4 = vcmask 785920  }
  0x47   :  { %6946 = vmatprep.mubr.f32.mxu0 %v8300_v12  ;;  %6979 = vmatprep.subr.mxu1 %v8305_v14  ;;  %v1615_v53 = vmul.f32 %v8354_v36, %v8349_v35  ;;  %v1614_v55 = vmul.f32 %v8388_v43, %v8373_v40  ;;  %v1616_v57 = vmul.f32 %v8383_v42, %v8378_v41  ;;  %vm4884_vm5 = vcmask 1048320   ;;  %p8138_p11 = pnand %p8137_p10, %p8131_p7 }
  0x48   :  { %6949 = vmatprep.subr.mxu0 %v8305_v14  ;;  %vm6542_vm6 = vcmask 31744   ;;  %vm6555_vm7 = vcmask 64544   ;;  %vm6568_vm8 = vcmask 97344   ;;  %vm6571_vm9 = vcmask 261216  }
  0x4c   :  { %6977 = vmatmul.mubr.f32.vlgmr.msra.gmra.mrb[0].mxu1 %v8294_v9 }
  0x4d   :  { %6947 = vmatmul.mubr.f32.vlgmr.msra.gmra.mrb[0].mxu0 %v8302_v13  ;;  %6980 = vmatpush3.msra.mxu1 %v8305_v14 }
  0x4e   :  { %6981 = vmatprep.mubr.f32.mxu1 %v688_v15  ;;  %6950 = vmatpush3.msra.mxu0 %v8305_v14  ;;  %v1717_v15 = vand.u32 4294901760, %v8444_v2 }
  0x4f   :  { %6951 = vmatprep.mubr.f32.mxu0 %v191_v17  ;;  %6984 = vmatprep.subr.mxu1 %v8282_v3  ;;  %v8464_v17 = vsub.f32 %v107_v58, %v1653_v0  ;;  %v8581_v0 = vadd.f32 %v1616_v57, %v1614_v55 }
  0x50   :  { %6954 = vmatprep.subr.mxu0 %v8282_v3  ;;  %v1718_v24 = vsub.f32 %v8444_v2, %v1717_v15 }
  0x51   :  { %v1752_v26 = vand.u32 4294901760, %v8464_v17 }
  0x52   :  { %v1719_v33 = vand.u32 4294901760, %v1718_v24 }
  0x54   :  { %6982 = vmatmul.mubr.f32.vlgmr.msra.gmra.mrb[0].mxu1 %v8310_v16  ;;  %v1745_v16 = vand.u32 4294901760, %v8446_v4 }
  0x55   :  { %6952 = vmatmul.mubr.f32.vlgmr.msra.gmra.mrb[0].mxu0 %v8315_v18  ;;  %6985 = vmatpush3.msra.mxu1 %v8282_v3  ;;  %v8466_v18 = vsub.f32 %v108_v59, %v1656_v1  ;;  %v1625_v1 = vmul.f32 %v8354_v36, %v8354_v36 }
  0x56   :  { %6986 = vmatprep.mubr.f32.mxu1 %v689_v20  ;;  %6955 = vmatpush3.msra.mxu0 %v8282_v3  ;;  %v1186_v20 = vand.u32 4294901760, %v8451_v5  ;;  %v1746_v25 = vsub.f32 %v8446_v4, %v1745_v16  ;;  %v8572_v58 = vpack.c.bf16 %v1745_v16, %v1738_v10 }
  0x57   :  { %6956 = vmatprep.mubr.f32.mxu0 %v192_v22  ;;  %6989 = vmatprep.subr.mxu1 %v8318_v19  ;;  %v1739_v22 = vsub.f32 %v8437_v62, %v1738_v10  ;;  %v1759_v27 = vand.u32 4294901760, %v8466_v18  ;;  %v1621_v10 = vmul.f32 %v8349_v35, %v8349_v35 }
  0x58   :  { %6959 = vmatprep.subr.mxu0 %v8318_v19  ;;  %v1747_v38 = vand.u32 4294901760, %v1746_v25  ;;  %v1620_v25 = vmul.f32 %v8373_v40, %v8373_v40 }
  0x59   :  { %v1740_v31 = vand.u32 4294901760, %v1739_v22  ;;  %v1760_v39 = vsub.f32 %v8466_v18, %v1759_v27  ;;  %v8588_v62 = vpack.c.bf16 %v1759_v27, %v1752_v26 }
  0x5b   :  { %v8514_v48 = vpack.c.bf16 %v1747_v38, %v1740_v31  ;;  %v1761_v50 = vand.u32 4294901760, %v1760_v39 }
  0x5c   :  { %6987 = vmatmul.mubr.f32.vlgmr.msra.gmra.mrb[0].mxu1 %v699_v21  ;;  %v8471_v21 = vsub.f32 %v1644_v61, %v8454_v6 }
  0x5d   :  { %6957 = vmatmul.mubr.f32.vlgmr.msra.gmra.mrb[0].mxu0 %v202_v23  ;;  %6990 = vmatpush3.msra.mxu1 %v8318_v19  ;;  %v1196_v23 = vand.u32 4294901760, %v8460_v11 }
  0x5e   :  { %6991 = vmatprep.mubr.f32.mxu1 %v8292_v8  ;;  %6960 = vmatpush3.msra.mxu0 %v8318_v19  ;;  %v1727_v28 = vand.u32 4294901760, %v8471_v21 }
  0x5f   :  { %6961 = vmatprep.mubr.f32.mxu0 %v8300_v12  ;;  %6994 = vmatprep.subr.mxu1 %v8282_v3  ;;  %v1197_v32 = vsub.f32 %v8460_v11, %v1196_v23 }
  0x60   :  { %6964 = vmatprep.subr.mxu0 %v8282_v3  ;;  %v1728_v46 = vsub.f32 %v8471_v21, %v1727_v28 }
  0x61   :  { %v1198_v47 = vand.u32 4294901760, %v1197_v32 }
  0x64   :  { %6992 = vmatmul.mubr.f32.vlgmr.msra.gmra.mrb[0].mxu1 %v8294_v9 }
  0x65   :  { %6962 = vmatmul.mubr.f32.vlgmr.msra.gmra.mrb[0].mxu0 %v8302_v13  ;;  %6995 = vmatpush3.msra.mxu1 %v8282_v3 }
  0x66   :  { %6996 = vmatprep.mubr.f32.mxu1 %v8292_v8  ;;  %7552 = vmatprep.subr.bf16.mxu1 %v8456_v7  ;;  %v1187_v8 = vsub.f32 %v8451_v5, %v1186_v20 }
  0x67   :  { %6965 = vmatpush3.msra.mxu0 %v8282_v3  ;;  %6966 = vmatprep.mubr.f32.mxu0 %v8300_v12  ;;  %v1753_v12 = vsub.f32 %v8464_v17, %v1752_v26 }
  0x68   :  { %6999 = vmatprep.subr.mxu0 %v8282_v3  ;;  %v1188_v45 = vand.u32 4294901760, %v1187_v8 }
  0x69   :  { %v1754_v49 = vand.u32 4294901760, %v1753_v12  ;;  %v8670_v12 = vld [vmem:[#allocation2 + $0x8] sm:$0xff] }
  0x6c   :  { %6997 = vmatmul.mubr.f32.vlgmr.msra.gmra.mrb[0].mxu1 %v8294_v9  ;;  %v1729_v9 = vand.u32 4294901760, %v1728_v46 }
  0x6d   :  { %7554 = vmatpush3.bf16.msra.mxu1 %v8456_v7  ;;  %6967 = vmatmul.mubr.f32.vlgmr.msra.gmra.mrb[0].mxu0 %v8302_v13  ;;  %v8520_v13 = vpack.c.bf16 %v1761_v50, %v1754_v49 }
  0x6e   :  { %7556 = vmatprep.subr.bf16.mxu1 %v8496_v30  ;;  %7037 = vmatprep.mubr.f32.mxu1 %v1719_v33 }
  0x6f   :  { %7000 = vmatpush3.msra.mxu0 %v8282_v3  ;;  %7001 = vmatprep.mubr.f32.mxu0 %v1188_v45 }
  0x70   :  { %7004 = vmatprep.subr.mxu0 %v8330_v29 }
  0x71   :  { %7558 = vmatpush3.bf16.msra.mxu1 %v8496_v30  ;;  %7002 = vmatmul.mubr.f32.vlgmr.msra.gmra.mrb[2].mxu0 %v1198_v47 }
  0x72   :  { %7560 = vmatprep.subr.bf16.mxu1 %v8514_v48  ;;  %7005 = vmatpush3.msra.mxu0 %v8330_v29  ;;  %v8537_v29 = vpack.c.bf16 %v8466_v18, %v8464_v17  ;;  %v1626_v18 = vmul.f32 %v8383_v42, %v8383_v42 }
  0x73   :  { %7006 = vmatprep.mubr.f32.mxu0 %v8428_v60  ;;  %7009 = vmatprep.subr.mxu0 %v8305_v14 }
  0x74   :  { %7038 = vmatmul.mubr.f32.vlgmr.msra.gmra.mrb[2].mxu1 %v1729_v9 }
  0x75   :  { %7562 = vmatpush3.bf16.msra.mxu1 %v8514_v48  ;;  %7048 = vmatprep.mubr.f32.mxu1 %v8419_v56 }
  0x76   :  { %7564 = vmatprep.subr.bf16.mxu1 %v8520_v13 }
  0x79   :  { %7566 = vmatpush3.bf16.msra.mxu1 %v8520_v13  ;;  %7007 = vmatmul.mubr.f32.vlgmr.msra.gmra.mrb[2].mxu0 %v8439_v63 }
  0x7a   :  { %7568 = vmatprep.subr.bf16.mxu1 %v8530_v51  ;;  %7010 = vmatpush3.msra.mxu0 %v8305_v14  ;;  %v8554_v14 = vadd.f32 %v1615_v53, %v1613_v52 }
  0x7b   :  { %7011 = vmatprep.mubr.f32.mxu0 %v8451_v5  ;;  %7014 = vmatprep.subr.mxu0 %v8282_v3  ;;  %v1619_v5 = vmul.f32 %v8343_v34, %v8343_v34 }
  0x7c   :  { %7049 = vmatmul.mubr.f32.vlgmr.msra.gmra.mrb[2].mxu1 %v8454_v6  ;;  %v2179_v59 = vsel %vm1639_vm1, %v8554_v14, 0 }
  0x7d   :  { %7570 = vmatpush3.bf16.msra.mxu1 %v8530_v51  ;;  %7059 = vmatprep.mubr.f32.mxu1 %v8444_v2  ;;  %v8579_v61 = vand.u32 4294901760, %v2179_v59  ;;  %v1627_v2 = vmul.f32 %v8359_v37, %v8359_v37 }
  0x7e   :  { %7572 = vmatprep.subr.bf16.mxu1 %v8537_v29 }
  0x7f   :  { %v8602_v4 = vsub.f32 %v2179_v59, %v8579_v61 }
  0x81   :  { %7574 = vmatpush3.bf16.msra.mxu1 %v8537_v29  ;;  %7012 = vmatmul.mubr.f32.vlgmr.msra.gmra.mrb[2].mxu0 %v8460_v11  ;;  %v8611_v11 = vadd.f32 %v1627_v2, %v1625_v1  ;;  %v2255_v17 = vand.u32 4294901760, %v8602_v4 }
  0x82   :  { %7576 = vmatprep.subr.bf16.mxu1 %v8456_v7  ;;  %7015 = vmatpush3.msra.mxu0 %v8282_v3 }
  0x83   :  { %7016 = vmatprep.mubr.f32.mxu0 %v1186_v20  ;;  %7019 = vmatprep.subr.mxu0 %v8318_v19  ;;  %v1628_v20 = vmul.f32 %v8388_v43, %v8388_v43 }
  0x84   :  { %7060 = vmatmul.mubr.f32.vlgmr.msra.gmra.mrb[2].mxu1 %v8471_v21  ;;  %v8629_v21 = vadd.f32 %v1621_v10, %v1619_v5 }
  0x85   :  { %7578 = vmatpush3.bf16.msra.mxu1 %v8456_v7  ;;  %7070 = vmatprep.mubr.f32.mxu1 %v1717_v15  ;;  %v8616_v15 = vld [vmem:[%s9163_s4] sm:$0xff]  ;;  %v8648_v26 = vadd.f32 %v1628_v20, %v1626_v18 }
  0x86   :  { %7580 = vmatprep.subr.bf16.mxu1 %v8496_v30  ;;  %v1633_v22 = vadd.f32 %v8611_v11, %v8616_v15  ;;  %v1631_v27 = vmul.f32 %v8629_v21, %v8616_v15 }
  0x89   :  { %7582 = vmatpush3.bf16.msra.mxu1 %v8496_v30  ;;  %7017 = vmatmul.mubr.f32.vlgmr.msra.gmra.mrb[2].mxu0 %v1196_v23  ;;  %v8635_v23 = vld [vmem:[#allocation2] sm:$0xff] }
  0x8a   :  { %7584 = vmatprep.subr.bf16.mxu1 %v8572_v58  ;;  %7020 = vmatpush3.msra.mxu0 %v8318_v19  ;;  %v2182_v19 = vsel %vm1639_vm1, %v8581_v0, 0  ;;  %v1635_v8 = vmul.f32 %v1633_v22, %v8635_v23 }
  0x8b   :  { %7021 = vmatprep.mubr.f32.mxu0 %v8428_v60  ;;  %7024 = vmatprep.subr.mxu0 %v8282_v3  ;;  %v8618_v16 = vand.u32 4294901760, %v2182_v19 }
  0x8c   :  { %7071 = vmatmul.mubr.f32.vlgmr.msra.gmra.mrb[2].mxu1 %v1727_v28  ;;  %v8657_v28 = vld [vmem:[%s9163_s4 + $0x8] sm:$0xff]  ;;  %v8668_v38 = vadd.f32 %v1635_v8, %v1631_v27 }
  0x8d   :  { %7586 = vmatpush3.bf16.msra.mxu1 %v8572_v58  ;;  %7081 = vmatprep.mubr.f32.mxu1 %v8419_v56  ;;  %v8639_v24 = vsub.f32 %v2182_v19, %v8618_v16  ;;  %v1634_v33 = vadd.f32 %v8648_v26, %v8657_v28 }
  0x8e   :  { %7588 = vmatprep.subr.bf16.mxu1 %v8588_v62  ;;  %v2717_v46 = vsel %vm1639_vm1, %v8668_v38, 0 }
  0x8f   :  { %v1636_v45 = vmul.f32 %v1634_v33, %v8670_v12  ;;  %v8685_v47 = vand.u32 4294901760, %v2717_v46 }
  0x91   :  { %7590 = vmatpush3.bf16.msra.mxu1 %v8588_v62  ;;  %7022 = vmatmul.mubr.f32.vlgmr.msra.gmra.mrb[2].mxu0 %v8439_v63  ;;  %v2792_v50 = vsub.f32 %v2717_v46, %v8685_v47 }
  0x92   :  { %7592 = vmatprep.subr.bf16.mxu1 %v8456_v7  ;;  %7025 = vmatpush3.msra.mxu0 %v8282_v3  ;;  %v2256_v3 = vsub.f32 %v8602_v4, %v2255_v17 }
  0x93   :  { %7026 = vmatprep.mubr.f32.mxu0 %v8428_v60  ;;  %7624 = vmatprep.subr.bf16.mxu0 %v8456_v7  ;;  %v1622_v60 = vmul.f32 %v8378_v41, %v8378_v41  ;;  %v2793_v53 = vand.u32 4294901760, %v2792_v50 }
  0x94   :  { %7082 = vmatmul.mubr.f32.vlgmr.msra.gmra.mrb[2].mxu1 %v8454_v6  ;;  %v2257_v31 = vand.u32 4294901760, %v2256_v3 }
  0x95   :  { %7594 = vmatpush3.bf16.msra.mxu1 %v8456_v7  ;;  %7092 = vmatprep.mubr.f32.mxu1 %v8419_v56  ;;  %v2265_v56 = vand.u32 4294901760, %v8639_v24  ;;  %v8662_v32 = vadd.f32 %v1622_v60, %v1620_v25  ;;  %v2794_v57 = vsub.f32 %v2792_v50, %v2793_v53 }
  0x96   :  { %7596 = vmatprep.subr.bf16.mxu1 %v8496_v30 }
  0x97   :  { %v1632_v39 = vmul.f32 %v8662_v32, %v8657_v28  ;;  %v2795_v1 = vand.u32 4294901760, %v2794_v57 }
  0x99   :  { %7598 = vmatpush3.bf16.msra.mxu1 %v8496_v30  ;;  %7027 = vmatmul.mubr.f32.vlgmr.msra.gmra.mrb[2].mxu0 %v8439_v63  ;;  %v2266_v63 = vsub.f32 %v8639_v24, %v2265_v56  ;;  %v8687_v49 = vadd.f32 %v1636_v45, %v1632_v39 }
  0x9a   :  { %7600 = vmatprep.subr.bf16.mxu1 %v8456_v7  ;;  %7626 = vmatpush3.bf16.msra.mxu0 %v8456_v7 }
  0x9b   :  { %7628 = vmatprep.subr.bf16.mxu0 %v8496_v30  ;;  %7136 = vmatprep.mubr.f32.mxu0 %v2255_v17  ;;  %v2720_v9 = vsel %vm1639_vm1, %v8687_v49, 0 }
  0x9c   :  { %7093 = vmatmul.mubr.f32.vlgmr.msra.gmra.mrb[2].mxu1 %v8454_v6  ;;  %v2267_v6 = vand.u32 4294901760, %v2266_v63  ;;  %v2801_v52 = vand.u32 4294901760, %v2720_v9 }
  0x9d   :  { %7602 = vmatpush3.bf16.msra.mxu1 %v8456_v7  ;;  %7103 = vmatprep.mubr.f32.mxu1 %v2257_v31 }
  0x9e   :  { %7604 = vmatprep.subr.bf16.mxu1 %v8496_v30  ;;  %7630 = vmatpush3.bf16.msra.mxu0 %v8496_v30  ;;  %v2802_v55 = vsub.f32 %v2720_v9, %v2801_v52 }
  0x9f   :  { %7632 = vmatprep.subr.bf16.mxu0 %v8572_v58 }
  0xa0   :  { %v2803_v59 = vand.u32 4294901760, %v2802_v55 }
  0xa1   :  { %7606 = vmatpush3.bf16.msra.mxu1 %v8496_v30  ;;  %7137 = vmatmul.mubr.f32.vlgmr.msra.gmra.mrb[4].mxu0 %v2265_v56 }
  0xa2   :  { %7608 = vmatprep.subr.bf16.mxu1 %v8514_v48  ;;  %7634 = vmatpush3.bf16.msra.mxu0 %v8572_v58 }
  0xa3   :  { %7636 = vmatprep.subr.bf16.mxu0 %v8588_v62  ;;  %7147 = vmatprep.mubr.f32.mxu0 %v8579_v61 }
  0xa4   :  { %7104 = vmatmul.mubr.f32.vlgmr.msra.gmra.mrb[4].mxu1 %v2267_v6 }
  0xa5   :  { %7610 = vmatpush3.bf16.msra.mxu1 %v8514_v48  ;;  %7114 = vmatprep.mubr.f32.mxu1 %v8579_v61 }
  0xa6   :  { %7612 = vmatprep.subr.bf16.mxu1 %v8520_v13  ;;  %7638 = vmatpush3.bf16.msra.mxu0 %v8588_v62 }
  0xa7   :  { %7640 = vmatprep.subr.bf16.mxu0 %v8456_v7 }
  0xa9   :  { %7614 = vmatpush3.bf16.msra.mxu1 %v8520_v13  ;;  %7148 = vmatmul.mubr.f32.vlgmr.msra.gmra.mrb[4].mxu0 %v8618_v16 }
  0xaa   :  { %7616 = vmatprep.subr.bf16.mxu1 %v8530_v51  ;;  %7642 = vmatpush3.bf16.msra.mxu0 %v8456_v7 }
  0xab   :  { %7644 = vmatprep.subr.bf16.mxu0 %v8496_v30  ;;  %7158 = vmatprep.mubr.f32.mxu0 %v8579_v61  ;;  %v2804_v61 = vsub.f32 %v2802_v55, %v2803_v59 }
  0xac   :  { %7115 = vmatmul.mubr.f32.vlgmr.msra.gmra.mrb[4].mxu1 %v8618_v16 }
  0xad   :  { %7618 = vmatpush3.bf16.msra.mxu1 %v8530_v51  ;;  %7125 = vmatprep.mubr.f32.mxu1 %v8602_v4  ;;  %v2805_v2 = vand.u32 4294901760, %v2804_v61 }
  0xae   :  { %7620 = vmatprep.subr.bf16.mxu1 %v8537_v29  ;;  %7646 = vmatpush3.bf16.msra.mxu0 %v8496_v30 }
  0xb1   :  { %7622 = vmatpush3.bf16.msra.mxu1 %v8537_v29  ;;  %7159 = vmatmul.mubr.f32.vlgmr.msra.gmra.mrb[4].mxu0 %v8618_v16 }
  0xb2   :  { %7648 = vmatprep.subr.bf16.mxu1 %v8456_v7 }
  0xb4   :  { %7126 = vmatmul.mubr.f32.vlgmr.msra.gmra.mrb[4].mxu1 %v8639_v24 }
  0xb5   :  { %7650 = vmatpush3.bf16.msra.mxu1 %v8456_v7  ;;  %7169 = vmatprep.mubr.f32.mxu1 %v2795_v1 }
  0xb6   :  { %7652 = vmatprep.subr.bf16.mxu1 %v8496_v30 }
  0xb9   :  { %7654 = vmatpush3.bf16.msra.mxu1 %v8496_v30 }
  0xba   :  { %7656 = vmatprep.subr.bf16.mxu1 %v8514_v48 }
  0xbc   :  { %7170 = vmatmul.mubr.f32.vlgmr.msra.gmra.mrb[6].mxu1 %v2805_v2 }
  0xbd   :  { %7658 = vmatpush3.bf16.msra.mxu1 %v8514_v48  ;;  %7180 = vmatprep.mubr.f32.mxu1 %v8685_v47 }
  0xbe   :  { %7660 = vmatprep.subr.bf16.mxu1 %v8520_v13 }
  0xc1   :  { %7662 = vmatpush3.bf16.msra.mxu1 %v8520_v13 }
  0xc2   :  { %7664 = vmatprep.subr.bf16.mxu1 %v8530_v51 }
  0xc4   :  { %7181 = vmatmul.mubr.f32.vlgmr.msra.gmra.mrb[6].mxu1 %v2801_v52 }
  0xc5   :  { %7666 = vmatpush3.bf16.msra.mxu1 %v8530_v51  ;;  %7191 = vmatprep.mubr.f32.mxu1 %v2792_v50 }
  0xc6   :  { %7668 = vmatprep.subr.bf16.mxu1 %v8537_v29 }
  0xc9   :  { %7670 = vmatpush3.bf16.msra.mxu1 %v8537_v29 }
  0xca   :  { %7672 = vmatprep.subr.bf16.mxu1 %v8456_v7 }
  0xcc   :  { %7192 = vmatmul.mubr.f32.vlgmr.msra.gmra.mrb[6].mxu1 %v2802_v55 }
  0xcd   :  { %7674 = vmatpush3.bf16.msra.mxu1 %v8456_v7  ;;  %7202 = vmatprep.mubr.f32.mxu1 %v2793_v53 }
  0xce   :  { %7676 = vmatprep.subr.bf16.mxu1 %v8496_v30 }
  0xd1   :  { %7678 = vmatpush3.bf16.msra.mxu1 %v8496_v30 }
  0xd2   :  { %7680 = vmatprep.subr.bf16.mxu1 %v8572_v58 }
  0xd4   :  { %7203 = vmatmul.mubr.f32.vlgmr.msra.gmra.mrb[6].mxu1 %v2803_v59 }
  0xd5   :  { %7682 = vmatpush3.bf16.msra.mxu1 %v8572_v58  ;;  %7213 = vmatprep.mubr.f32.mxu1 %v8685_v47  ;;  %v113_v58 = vld [vmem:[%s9171_s12] sm:$0xff] }
  0xd6   :  { %7684 = vmatprep.subr.bf16.mxu1 %v8588_v62 }
  0xd9   :  { %7686 = vmatpush3.bf16.msra.mxu1 %v8588_v62  ;;  %v3298_v62 = vsel %vm3296_vm2, %v113_v58, 0 }
  0xda   :  { %7688 = vmatprep.subr.bf16.mxu1 %v8456_v7  ;;  %v8746_v4 = vand.u32 4294901760, %v3298_v62 }
  0xdc   :  { %7214 = vmatmul.mubr.f32.vlgmr.msra.gmra.mrb[6].mxu1 %v2801_v52 }
  0xdd   :  { %7690 = vmatpush3.bf16.msra.mxu1 %v8456_v7  ;;  %7224 = vmatprep.mubr.f32.mxu1 %v8685_v47  ;;  %v8749_v7 = vsub.f32 %v3298_v62, %v8746_v4 }
  0xde   :  { %7692 = vmatprep.subr.bf16.mxu1 %v8496_v30 }
  0xdf   :  { %v8752_v19 = vand.u32 4294901760, %v8749_v7 }
  0xe1   :  { %7694 = vmatpush3.bf16.msra.mxu1 %v8496_v30  ;;  %v3373_v30 = vsub.f32 %v8749_v7, %v8752_v19 }
  0xe3   :  { %v8756_v5 = vand.u32 4294901760, %v3373_v30 }
  0xe4   :  { %7225 = vmatmul.mubr.f32.vlgmr.msra.gmra.mrb[6].mxu1 %v2801_v52 }
  0xe5   :  { %7231 = vmatprep.mubr.f32.mxu0 %v8756_v5  ;;  %7315 = vmatprep.mubr.f32.mxu1 %v8756_v5 }
 0x13f   :  { %v6998_v48 = vpop.f32.mrb[0].mxu1 }
 0x140   :  { %v1100_v13 = vpop.f32.mrb[1].mxu1  ;;  %v6968_v51 = vpop.f32.mrb[0].mxu0 }
 0x141   :  { %v603_v29 = vpop.f32.mrb[1].mxu0 }
 0x16c   :  { %v8760_v10 = vpop.f32.mrb[2].mxu0 }
 0x16d   :  { %v8762_v16 = vpop.f32.mrb[3].mxu0 }
 0x16f   :  { %v7094_v17 = vpop.f32.mrb[2].mxu1 }
 0x170   :  { %v2175_v18 = vsub.f32 %v6968_v51, %v7094_v17  ;;  %v2164_v20 = vpop.f32.mrb[3].mxu1 }
 0x171   :  { %v2174_v22 = vsub.f32 %v603_v29, %v2164_v20 }
 0x172   :  { %v2177_v3 = vadd.f32 %v2175_v18, %v8417_v54 }
 0x173   :  { %v2176_v27 = vadd.f32 %v2174_v22, %v8390_v44 }
 0x174   :  { %v3279_v63 = vmul.f32 %v2177_v3, %v8373_v40  ;;  %v8768_v39 = vmul.f32 %v2177_v3, %v8378_v41  ;;  %v5441_v46 = vmul.f32 %v2177_v3, %v8383_v42  ;;  %v8772_v6 = vmul.f32 %v2177_v3, %v8388_v43 }
 0x175   :  { %v3278_v54 = vmul.f32 %v2176_v27, %v8343_v34  ;;  %v8777_v44 = vmul.f32 %v2176_v27, %v8349_v35  ;;  %v5440_v50 = vmul.f32 %v2176_v27, %v8354_v36  ;;  %v8781_v9 = vmul.f32 %v2176_v27, %v8359_v37 }
 0x184   :  { %v7160_v24 = vpop.f32.mrb[4].mxu0 }
 0x185   :  { %v2702_v25 = vpop.f32.mrb[5].mxu0 }
 0x187   :  { %v7127_v60 = vpop.f32.mrb[4].mxu1 }
 0x188   :  { %v7911_v8 = vadd.f32 %v7160_v24, %v7127_v60  ;;  %v2446_v56 = vpop.f32.mrb[5].mxu1 }
 0x189   :  { %v7912_v31 = vadd.f32 %v2702_v25, %v2446_v56  ;;  %v4888_v25 = vstv %s4887_s9 }
 0x18a   :  { %v2713_v33 = vsub.f32 %v6998_v48, %v7911_v8  ;;  %v4890_v8 = vmul.f32 %v8760_v10, %v4888_v25 }
 0x18b   :  { %v2712_v45 = vsub.f32 %v1100_v13, %v7912_v31  ;;  %v3252_v13 = vstv %s6596_s13 }
 0x18c   :  { %v2715_v47 = vadd.f32 %v2713_v33, %v8581_v0  ;;  %v4891_v33 = vstv %s8820_s30 }
 0x18d   :  { %v2714_v52 = vadd.f32 %v2712_v45, %v8554_v14  ;;  %v4889_v45 = vmul.f32 %v4888_v25, %v8762_v16 }
 0x18e   :  { %v3281_v53 = vmul.f32 %v2715_v47, %v8378_v41  ;;  %v8786_v55 = vmul.f32 %v2715_v47, %v8373_v40  ;;  %v5443_v57 = vmul.f32 %v2715_v47, %v8388_v43  ;;  %v8790_v59 = vmul.f32 %v2715_v47, %v8383_v42 }
 0x18f   :  { %v3280_v0 = vmul.f32 %v2714_v52, %v8349_v35  ;;  %v8794_v1 = vmul.f32 %v2714_v52, %v8343_v34  ;;  %v5442_v61 = vmul.f32 %v2714_v52, %v8359_v37  ;;  %v8798_v2 = vmul.f32 %v2714_v52, %v8354_v36 }
 0x190   :  { %v3283_v14 = vadd.f32 %v3281_v53, %v3279_v63  ;;  %v3291_v40 = vsub.f32 %v8786_v55, %v8768_v39  ;;  %v8802_v41 = vadd.f32 %v5443_v57, %v5441_v46  ;;  %v5989_v42 = vsub.f32 %v8790_v59, %v8772_v6  ;;  %v109_v6 = vld [vmem:[%s9170_s11] sm:$0xff] }
 0x191   :  { %v3282_v43 = vadd.f32 %v3280_v0, %v3278_v54  ;;  %v3290_v35 = vsub.f32 %v8794_v1, %v8777_v44  ;;  %v8808_v34 = vadd.f32 %v5442_v61, %v5440_v50  ;;  %v5988_v37 = vsub.f32 %v8798_v2, %v8781_v9  ;;  %v110_v9 = vld [vmem:[%s9170_s11 + $0x8] sm:$0xff] }
 0x192   :  { %v8812_v36 = vstv %s6595_s5  ;;  %v4893_v52 = vadd.f32 %v4891_v33, %v4890_v8  ;;  %v4905_v59 = vand.u32 4294901760, %v109_v6 }
 0x193   :  { %v3267_v29 = vmul.f32 %v8812_v36, %v8657_v28  ;;  %v3266_v30 = vmul.f32 %v8812_v36, %v8616_v15  ;;  %v114_v28 = vld [vmem:[%s9171_s12 + $0x8] sm:$0xff] }
 0x194   :  { %v3301_v15 = vsel %vm3296_vm2, %v114_v28, 0 }
 0x1b7   :  { %v7226_v48 = vpop.f32.mrb[6].mxu1 }
 0x1b8   :  { %v3251_v51 = vsub.f32 %v7226_v48, %v8687_v49  ;;  %v3240_v58 = vpop.f32.mrb[7].mxu1  ;;  %v4892_v48 = vadd.f32 %v4891_v33, %v4889_v45 }
 0x1b9   :  { %v3250_v62 = vsub.f32 %v3240_v58, %v8668_v38  ;;  %v8829_v38 = vand.u32 4294901760, %v3301_v15 }
 0x1ba   :  { %v3254_v17 = vadd.f32 %v3252_v13, %v3251_v51 }
 0x1bb   :  { %v3253_v18 = vadd.f32 %v3252_v13, %v3250_v62  ;;  %v8832_v3 = vsub.f32 %v3301_v15, %v8829_v38 }
 0x1bc   :  { %v3256_v20 = vadd.f32 %v3254_v17, %v8670_v12  ;;  %v3269_v22 = vadd.f32 %v3267_v29, %v3254_v17 }
 0x1bd   :  { %v3255_v49 = vadd.f32 %v3253_v18, %v8635_v23  ;;  %v3268_v24 = vadd.f32 %v3266_v30, %v3253_v18  ;;  %v8838_v47 = vand.u32 4294901760, %v8832_v3 }
 0x1be   :  { %8044 = vrcp.f32 %v3256_v20 }
 0x1bf   :  { %8046 = vrcp.f32 %v3269_v22  ;;  %v3383_v29 = vsub.f32 %v8832_v3, %v8838_v47 }
 0x1c0   :  { %8048 = vrcp.f32 %v3255_v49 }
 0x1c1   :  { %8050 = vrcp.f32 %v3268_v24  ;;  %v8852_v25 = vand.u32 4294901760, %v3383_v29 }
 0x1c8   :  { %v8045_v12 = vpop.eup %8044 }
 0x1c9   :  { %v8047_v23 = vpop.eup %8046  ;;  %v3260_v60 = vmul.f32 %v8045_v12, %v3256_v20 }
 0x1ca   :  { %v8049_v27 = vpop.eup %8048  ;;  %v3273_v56 = vmul.f32 %v8047_v23, %v3269_v22 }
 0x1cb   :  { %v8051_v31 = vpop.eup %8050  ;;  %v3262_v63 = vsub.f32 2.0, %v3260_v60  ;;  %v3259_v39 = vmul.f32 %v8049_v27, %v3255_v49 }
 0x1cc   :  { %v3275_v46 = vsub.f32 2.0, %v3273_v56  ;;  %v3272_v54 = vmul.f32 %v8051_v31, %v3268_v24 }
 0x1cd   :  { %v3264_v44 = vmul.f32 %v8045_v12, %v3262_v63  ;;  %v3261_v50 = vsub.f32 2.0, %v3259_v39 }
 0x1ce   :  { %v3277_v53 = vmul.f32 %v8047_v23, %v3275_v46  ;;  %v3274_v55 = vsub.f32 2.0, %v3272_v54 }
 0x1cf   :  { %v3285_v57 = vmul.f32 %v3283_v14, %v3264_v44  ;;  %v3293_v0 = vmul.f32 %v3291_v40, %v3264_v44  ;;  %v3295_v1 = vmul.f32 %v3264_v44, %v8662_v32  ;;  %v3263_v61 = vmul.f32 %v8049_v27, %v3261_v50 }
 0x1d0   :  { %v8841_v13 = vmul.f32 %v4893_v52, %v3277_v53  ;;  %v3276_v51 = vmul.f32 %v8051_v31, %v3274_v55 }
 0x1d1   :  { %v3307_v58 = vand.u32 4294901760, %v3295_v1  ;;  %v3817_v62 = vand.u32 4294901760, %v3285_v57  ;;  %v4321_v30 = vand.u32 4294901760, %v3293_v0  ;;  %v3284_v17 = vmul.f32 %v3282_v43, %v3263_v61 }
 0x1d2   :  { %v3292_v18 = vmul.f32 %v3290_v35, %v3263_v61  ;;  %v3294_v20 = vmul.f32 %v3263_v61, %v8629_v21  ;;  %v8846_v22 = vmul.f32 %v4892_v48, %v3276_v51  ;;  %v8850_v32 = vmul.f32 %v8802_v41, %v8841_v13 }
 0x1d3   :  { %v3814_v14 = vand.u32 4294901760, %v3284_v17  ;;  %v3399_v40 = vsub.f32 %v3295_v1, %v3307_v58  ;;  %v4413_v49 = vsub.f32 %v3293_v0, %v4321_v30  ;;  %v3909_v24 = vsub.f32 %v3285_v57, %v3817_v62 }
 0x1d4   :  { %v3304_v28 = vand.u32 4294901760, %v3294_v20  ;;  %v4318_v15 = vand.u32 4294901760, %v3292_v18  ;;  %v8856_v43 = vmul.f32 %v8808_v34, %v8846_v22 }
 0x1d5   :  { %v3400_v35 = vand.u32 4294901760, %v3399_v40  ;;  %v4414_v21 = vand.u32 4294901760, %v4413_v49  ;;  %v8858_v12 = vpack.c.bf16 %v3817_v62, %v3814_v14  ;;  %v3902_v23 = vsub.f32 %v3284_v17, %v3814_v14  ;;  %v112_v14 = vld [vmem:[%s9170_s11 + $0x18] sm:$0xff] }
 0x1d6   :  { %v8860_v60 = vpack.c.bf16 %v3307_v58, %v3304_v28  ;;  %v8862_v41 = vpack.c.bf16 %v4321_v30, %v4318_v15  ;;  %v3392_v27 = vsub.f32 %v3294_v20, %v3304_v28  ;;  %v4406_v8 = vsub.f32 %v3292_v18, %v4318_v15 }
 0x1d7   :  { %v3401_v56 = vsub.f32 %v3399_v40, %v3400_v35  ;;  %v4415_v31 = vsub.f32 %v4413_v49, %v4414_v21  ;;  %v3903_v33 = vand.u32 4294901760, %v3902_v23  ;;  %v3910_v63 = vand.u32 4294901760, %v3909_v24 }
 0x1d8   :  { %7696 = vmatprep.subr.bf16.mxu0 %v8860_v60  ;;  %7744 = vmatprep.subr.bf16.mxu1 %v8862_v41  ;;  %v3393_v34 = vand.u32 4294901760, %v3392_v27  ;;  %v4407_v39 = vand.u32 4294901760, %v4406_v8  ;;  %v7703_v45 = vpack.c.bf16 %v3399_v40, %v3392_v27  ;;  %v7751_v46 = vpack.c.bf16 %v4413_v49, %v4406_v8 }
 0x1d9   :  { %7698 = vmatpush3.bf16.msra.mxu0 %v8860_v60  ;;  %7746 = vmatpush3.bf16.msra.mxu1 %v8862_v41  ;;  %v3402_v54 = vand.u32 4294901760, %v3401_v56  ;;  %v4416_v44 = vand.u32 4294901760, %v4415_v31  ;;  %v3904_v50 = vsub.f32 %v3902_v23, %v3903_v33  ;;  %v3911_v52 = vsub.f32 %v3909_v24, %v3910_v63 }
 0x1da   :  { %v3394_v53 = vsub.f32 %v3392_v27, %v3393_v34  ;;  %v4408_v55 = vsub.f32 %v4406_v8, %v4407_v39  ;;  %v7711_v57 = vpack.c.bf16 %v3400_v35, %v3393_v34  ;;  %v7759_v0 = vpack.c.bf16 %v4414_v21, %v4407_v39 }
 0x1db   :  { %v3905_v1 = vand.u32 4294901760, %v3904_v50  ;;  %v3912_v61 = vand.u32 4294901760, %v3911_v52  ;;  %v8868_v48 = vpack.c.bf16 %v3909_v24, %v3902_v23  ;;  %v8876_v62 = vpack.c.bf16 %v3910_v63, %v3903_v33 }
 0x1dc   :  { %7232 = vmatmul.mubr.f32.vlgmr.msra.gmra.mrb[6].mxu0 %v8852_v25  ;;  %7316 = vmatmul.mubr.f32.vlgmr.msra.gmra.mrb[8].mxu1 %v8852_v25  ;;  %v3395_v51 = vand.u32 4294901760, %v3394_v53  ;;  %v4409_v29 = vand.u32 4294901760, %v4408_v55  ;;  %v8882_v18 = vmul.f32 %v5988_v37, %v8846_v22  ;;  %v8888_v20 = vmul.f32 %v5989_v42, %v8841_v13  ;;  %v111_v37 = vld [vmem:[%s9170_s11 + $0x10] sm:$0xff]  ;;  %s6594_s11 = sld [smem:[#allocation8 + $0x2]] }
 0x1dd   :  { %7238 = vmatprep.mubr.f32.mxu0 %v8746_v4  ;;  %7322 = vmatprep.mubr.f32.mxu1 %v8746_v4  ;;  %v8874_v58 = vpack.c.bf16 %v3912_v61, %v3905_v1  ;;  %v5449_v2 = vsel %vm1639_vm1, %v8856_v43, 0  ;;  %v4908_v42 = vand.u32 4294901760, %v110_v9  ;;  %v8920_v49 = vsub.f32 %v109_v6, %v4905_v59 }
 0x1de   :  { %v7699_v30 = vpack.c.bf16 %v3402_v54, %v3395_v51  ;;  %v7747_v17 = vpack.c.bf16 %v4416_v44, %v4409_v29  ;;  %v8918_v40 = vand.u32 4294901760, %v5449_v2  ;;  %v4911_v24 = vand.u32 4294901760, %v111_v37 }
 0x1df   :  { %v4914_v28 = vand.u32 4294901760, %v112_v14  ;;  %v8924_v15 = vsub.f32 %v110_v9, %v4908_v42  ;;  %v5452_v43 = vsel %vm1639_vm1, %v8850_v32, 0  ;;  %v4996_v21 = vand.u32 4294901760, %v8920_v49 }
 0x1e0   :  { %7700 = vmatprep.subr.bf16.mxu0 %v7699_v30  ;;  %7748 = vmatprep.subr.bf16.mxu1 %v7747_v17  ;;  %v8931_v35 = vsub.f32 %v5449_v2, %v8918_v40  ;;  %v8934_v23 = vand.u32 4294901760, %v5452_v43  ;;  %v8937_v8 = vsub.f32 %v111_v37, %v4911_v24  ;;  %v8941_v31 = vpack.c.bf16 %v4908_v42, %v4905_v59 }
 0x1e1   :  { %7702 = vmatpush3.bf16.msra.mxu0 %v7699_v30  ;;  %7750 = vmatpush3.bf16.msra.mxu1 %v7747_v17  ;;  %v5003_v27 = vand.u32 4294901760, %v8924_v15  ;;  %v8939_v56 = vsub.f32 %v112_v14, %v4914_v28  ;;  %v4997_v33 = vsub.f32 %v8920_v49, %v4996_v21  ;;  %v8973_v52 = vpack.c.bf16 %v4914_v28, %v4911_v24 }
 0x1e2   :  { %7704 = vmatprep.subr.bf16.mxu0 %v7703_v45  ;;  %7752 = vmatprep.subr.bf16.mxu1 %v7751_v46  ;;  %v5525_v32 = vand.u32 4294901760, %v8931_v35  ;;  %v8954_v63 = vsub.f32 %v5452_v43, %v8934_v23  ;;  %v5010_v39 = vand.u32 4294901760, %v8937_v8  ;;  %v4896_v29 = vmul.f32 %v8846_v22, %v8611_v11 }
 0x1e3   :  { %v5004_v34 = vsub.f32 %v8924_v15, %v5003_v27  ;;  %v9034_v11 = vpack.c.bf16 %v5003_v27, %v4996_v21  ;;  %v5996_v42 = vsel %vm1639_vm1, %v8888_v20, 0 }
 0x1e4   :  { %7239 = vmatmul.mubr.f32.vlgmr.msra.gmra.mrb[6].mxu0 %v8829_v38  ;;  %7323 = vmatmul.mubr.f32.vlgmr.msra.gmra.mrb[8].mxu1 %v8829_v38  ;;  %v5011_v44 = vsub.f32 %v8937_v8, %v5010_v39 }
 0x1e5   :  { %7706 = vmatpush3.bf16.msra.mxu0 %v7703_v45  ;;  %7754 = vmatpush3.bf16.msra.mxu1 %v7751_v46  ;;  %v4998_v45 = vand.u32 4294901760, %v4997_v33  ;;  %v5535_v46 = vand.u32 4294901760, %v8954_v63  ;;  %v5005_v54 = vand.u32 4294901760, %v5004_v34 }
 0x1e6   :  { %7708 = vmatprep.subr.bf16.mxu0 %v8860_v60  ;;  %7756 = vmatprep.subr.bf16.mxu1 %v8862_v41 }
 0x1e7   :  { %7245 = vmatprep.mubr.f32.mxu0 %v8749_v7  ;;  %7329 = vmatprep.mubr.f32.mxu1 %v8749_v7  ;;  %v5536_v55 = vsub.f32 %v8954_v63, %v5535_v46 }
 0x1e9   :  { %v5537_v61 = vand.u32 4294901760, %v5536_v55 }
 0x1ec   :  { %7246 = vmatmul.mubr.f32.vlgmr.msra.gmra.mrb[6].mxu0 %v8832_v3  ;;  %7330 = vmatmul.mubr.f32.vlgmr.msra.gmra.mrb[8].mxu1 %v8832_v3 }
 0x1ed   :  { %7710 = vmatpush3.bf16.msra.mxu0 %v8860_v60  ;;  %7758 = vmatpush3.bf16.msra.mxu1 %v8862_v41 }
 0x1ee   :  { %7712 = vmatprep.subr.bf16.mxu0 %v7711_v57  ;;  %7760 = vmatprep.subr.bf16.mxu1 %v7759_v0 }
 0x1ef   :  { %7252 = vmatprep.mubr.f32.mxu0 %v8752_v19  ;;  %7336 = vmatprep.mubr.f32.mxu1 %v8752_v19 }
 0x1f4   :  { %7253 = vmatmul.mubr.f32.vlgmr.msra.gmra.mrb[6].mxu0 %v8838_v47  ;;  %7337 = vmatmul.mubr.f32.vlgmr.msra.gmra.mrb[8].mxu1 %v8838_v47 }
 0x1f5   :  { %7714 = vmatpush3.bf16.msra.mxu0 %v7711_v57  ;;  %7762 = vmatpush3.bf16.msra.mxu1 %v7759_v0  ;;  %v8983_v57 = vpack.c.bf16 %v5005_v54, %v4998_v45  ;;  %v5012_v0 = vand.u32 4294901760, %v5011_v44 }
 0x1f6   :  { %7716 = vmatprep.subr.bf16.mxu0 %v8860_v60  ;;  %7764 = vmatprep.subr.bf16.mxu1 %v8862_v41 }
 0x1f7   :  { %7259 = vmatprep.mubr.f32.mxu0 %v8746_v4  ;;  %7343 = vmatprep.mubr.f32.mxu1 %v8746_v4 }
 0x1fc   :  { %7260 = vmatmul.mubr.f32.vlgmr.msra.gmra.mrb[6].mxu0 %v8829_v38  ;;  %7344 = vmatmul.mubr.f32.vlgmr.msra.gmra.mrb[8].mxu1 %v8829_v38 }
 0x1fd   :  { %7718 = vmatpush3.bf16.msra.mxu0 %v8860_v60  ;;  %7766 = vmatpush3.bf16.msra.mxu1 %v8862_v41  ;;  %v5017_v60 = vand.u32 4294901760, %v8939_v56  ;;  %v5526_v41 = vsub.f32 %v8931_v35, %v5525_v32 }
 0x1fe   :  { %7720 = vmatprep.subr.bf16.mxu0 %v8858_v12  ;;  %7266 = vmatprep.mubr.f32.mxu0 %v8746_v4 }
 0x1ff   :  { %7350 = vmatprep.mubr.f32.mxu1 %v8746_v4  ;;  %7816 = vmatprep.subr.bf16.mxu1 %v8941_v31  ;;  %v5018_v50 = vsub.f32 %v8939_v56, %v5017_v60  ;;  %v5527_v53 = vand.u32 4294901760, %v5526_v41 }
 0x201   :  { %v5019_v1 = vand.u32 4294901760, %v5018_v50 }
 0x203   :  { %v8992_v51 = vpack.c.bf16 %v5019_v1, %v5012_v0 }
 0x204   :  { %7267 = vmatmul.mubr.f32.vlgmr.msra.gmra.mrb[6].mxu0 %v8829_v38  ;;  %7351 = vmatmul.mubr.f32.vlgmr.msra.gmra.mrb[8].mxu1 %v8829_v38 }
 0x205   :  { %7722 = vmatpush3.bf16.msra.mxu0 %v8858_v12  ;;  %7818 = vmatpush3.bf16.msra.mxu1 %v8941_v31 }
 0x206   :  { %7724 = vmatprep.subr.bf16.mxu0 %v8874_v58  ;;  %7427 = vmatprep.mubr.f32.mxu1 %v5527_v53 }
 0x207   :  { %7273 = vmatprep.mubr.f32.mxu0 %v8756_v5  ;;  %7820 = vmatprep.subr.bf16.mxu1 %v8973_v52  ;;  %v9000_v5 = vpack.c.bf16 %v8924_v15, %v8920_v49 }
 0x208   :  { %7274 = vmatmul.mubr.f32.vlgmr.msra.gmra.mrb[8].mxu0 %v8852_v25  ;;  %v9009_v25 = vpack.c.bf16 %v8939_v56, %v8937_v8 }
 0x209   :  { %7726 = vmatpush3.bf16.msra.mxu0 %v8874_v58  ;;  %7822 = vmatpush3.bf16.msra.mxu1 %v8973_v52  ;;  %v9049_v58 = vpack.c.bf16 %v5017_v60, %v5010_v39 }
 0x20a   :  { %7728 = vmatprep.subr.bf16.mxu0 %v8868_v48  ;;  %7824 = vmatprep.subr.bf16.mxu1 %v8983_v57 }
 0x20b   :  { %7280 = vmatprep.mubr.f32.mxu0 %v8746_v4 }
 0x20c   :  { %7428 = vmatmul.mubr.f32.vlgmr.msra.gmra.mrb[10].mxu1 %v5537_v61 }
 0x20d   :  { %7826 = vmatpush3.bf16.msra.mxu1 %v8983_v57  ;;  %7438 = vmatprep.mubr.f32.mxu1 %v8918_v40 }
 0x20e   :  { %7828 = vmatprep.subr.bf16.mxu1 %v8992_v51 }
 0x210   :  { %7281 = vmatmul.mubr.f32.vlgmr.msra.gmra.mrb[8].mxu0 %v8829_v38 }
 0x211   :  { %7730 = vmatpush3.bf16.msra.mxu0 %v8868_v48  ;;  %7830 = vmatpush3.bf16.msra.mxu1 %v8992_v51  ;;  %v4821_v48 = vstv %s6594_s11 }
 0x212   :  { %7732 = vmatprep.subr.bf16.mxu0 %v8858_v12  ;;  %7832 = vmatprep.subr.bf16.mxu1 %v9000_v5  ;;  %8052 = vrcp.f32 %v4821_v48 }
 0x213   :  { %7287 = vmatprep.mubr.f32.mxu0 %v8749_v7  ;;  %v4899_v7 = vsel %vm1639_vm1, %v4896_v29, 0 }
 0x214   :  { %7439 = vmatmul.mubr.f32.vlgmr.msra.gmra.mrb[10].mxu1 %v8934_v23 }
 0x215   :  { %7834 = vmatpush3.bf16.msra.mxu1 %v9000_v5  ;;  %7449 = vmatprep.mubr.f32.mxu1 %v8931_v35 }
 0x216   :  { %7836 = vmatprep.subr.bf16.mxu1 %v9009_v25 }
 0x218   :  { %7288 = vmatmul.mubr.f32.vlgmr.msra.gmra.mrb[8].mxu0 %v8832_v3  ;;  %v9039_v3 = vand.u32 4294901760, %v4899_v7 }
 0x219   :  { %7734 = vmatpush3.bf16.msra.mxu0 %v8858_v12  ;;  %7838 = vmatpush3.bf16.msra.mxu1 %v9009_v25 }
 0x21a   :  { %7736 = vmatprep.subr.bf16.mxu0 %v8876_v62  ;;  %7840 = vmatprep.subr.bf16.mxu1 %v8941_v31 }
 0x21b   :  { %7294 = vmatprep.mubr.f32.mxu0 %v8752_v19  ;;  %v4897_v19 = vmul.f32 %v8841_v13, %v8648_v26 }
 0x21c   :  { %7450 = vmatmul.mubr.f32.vlgmr.msra.gmra.mrb[10].mxu1 %v8954_v63  ;;  %v8053_v22 = vpop.eup %8052 }
 0x21d   :  { %7842 = vmatpush3.bf16.msra.mxu1 %v8941_v31  ;;  %7460 = vmatprep.mubr.f32.mxu1 %v5525_v32  ;;  %8031 = vpush %v8053_v22  ;;  %v4902_v26 = vsel %vm1639_vm1, %v4897_v19, 0 }
 0x21e   :  { %7844 = vmatprep.subr.bf16.mxu1 %v8973_v52  ;;  %v9059_v13 = vand.u32 4294901760, %v4902_v26 }
 0x220   :  { %7295 = vmatmul.mubr.f32.vlgmr.msra.gmra.mrb[8].mxu0 %v8838_v47  ;;  %v4974_v47 = vsub.f32 %v4899_v7, %v9039_v3  ;;  %v4984_v30 = vsub.f32 %v4902_v26, %v9059_v13 }
 0x221   :  { %7738 = vmatpush3.bf16.msra.mxu0 %v8876_v62  ;;  %7846 = vmatpush3.bf16.msra.mxu1 %v8973_v52 }
 0x222   :  { %7740 = vmatprep.subr.bf16.mxu0 %v8858_v12  ;;  %7848 = vmatprep.subr.bf16.mxu1 %v9034_v11  ;;  %v4975_v62 = vand.u32 4294901760, %v4974_v47 }
 0x223   :  { %7301 = vmatprep.mubr.f32.mxu0 %v8746_v4 }
 0x224   :  { %7461 = vmatmul.mubr.f32.vlgmr.msra.gmra.mrb[10].mxu1 %v5535_v46  ;;  %v4976_v17 = vsub.f32 %v4974_v47, %v4975_v62 }
 0x225   :  { %7850 = vmatpush3.bf16.msra.mxu1 %v9034_v11  ;;  %7471 = vmatprep.mubr.f32.mxu1 %v8918_v40 }
 0x226   :  { %7852 = vmatprep.subr.bf16.mxu1 %v9049_v58  ;;  %v4977_v6 = vand.u32 4294901760, %v4976_v17 }
 0x228   :  { %7302 = vmatmul.mubr.f32.vlgmr.msra.gmra.mrb[8].mxu0 %v8829_v38 }
 0x229   :  { %7742 = vmatpush3.bf16.msra.mxu0 %v8858_v12  ;;  %7854 = vmatpush3.bf16.msra.mxu1 %v9049_v58  ;;  %v4985_v12 = vand.u32 4294901760, %v4984_v30 }
 0x22a   :  { %7856 = vmatprep.subr.bf16.mxu1 %v8941_v31  ;;  %7308 = vmatprep.mubr.f32.mxu0 %v8746_v4 }
 0x22b   :  { %7768 = vmatprep.subr.bf16.mxu0 %v8941_v31  ;;  %v4986_v4 = vsub.f32 %v4984_v30, %v4985_v12 }
 0x22c   :  { %7472 = vmatmul.mubr.f32.vlgmr.msra.gmra.mrb[10].mxu1 %v8934_v23 }
 0x22d   :  { %7858 = vmatpush3.bf16.msra.mxu1 %v8941_v31  ;;  %7482 = vmatprep.mubr.f32.mxu1 %v8918_v40  ;;  %v4987_v9 = vand.u32 4294901760, %v4986_v4 }
 0x22e   :  { %7860 = vmatprep.subr.bf16.mxu1 %v8973_v52 }
 0x230   :  { %7309 = vmatmul.mubr.f32.vlgmr.msra.gmra.mrb[8].mxu0 %v8829_v38  ;;  %v5993_v38 = vsel %vm1639_vm1, %v8882_v18, 0  ;;  %v6077_v18 = vand.u32 4294901760, %v5996_v42 }
 0x231   :  { %7770 = vmatpush3.bf16.msra.mxu0 %v8941_v31  ;;  %7862 = vmatpush3.bf16.msra.mxu1 %v8973_v52  ;;  %v6067_v59 = vand.u32 4294901760, %v5993_v38 }
 0x232   :  { %7361 = vmatprep.mubr.f32.mxu0 %v4977_v6  ;;  %7772 = vmatprep.subr.bf16.mxu0 %v8973_v52  ;;  %v6078_v14 = vsub.f32 %v5996_v42, %v6077_v18 }
 0x233   :  { %v6068_v2 = vsub.f32 %v5993_v38, %v6067_v59 }
 0x234   :  { %7483 = vmatmul.mubr.f32.vlgmr.msra.gmra.mrb[10].mxu1 %v8934_v23  ;;  %v6079_v20 = vand.u32 4294901760, %v6078_v14 }
 0x235   :  { %7774 = vmatpush3.bf16.msra.mxu0 %v8973_v52  ;;  %v6069_v37 = vand.u32 4294901760, %v6068_v2 }
 0x236   :  { %7776 = vmatprep.subr.bf16.mxu0 %v8983_v57  ;;  %v6080_v24 = vsub.f32 %v6078_v14, %v6079_v20 }
 0x237   :  { %v6070_v40 = vsub.f32 %v6068_v2, %v6069_v37 }
 0x238   :  { %7362 = vmatmul.mubr.f32.vlgmr.msra.gmra.mrb[10].mxu0 %v4987_v9  ;;  %v6081_v28 = vand.u32 4294901760, %v6080_v24 }
 0x239   :  { %7778 = vmatpush3.bf16.msra.mxu0 %v8983_v57  ;;  %7372 = vmatprep.mubr.f32.mxu0 %v9039_v3  ;;  %v6071_v49 = vand.u32 4294901760, %v6070_v40 }
 0x23a   :  { %7780 = vmatprep.subr.bf16.mxu0 %v8992_v51 }
 0x23d   :  { %7782 = vmatpush3.bf16.msra.mxu0 %v8992_v51 }
 0x23e   :  { %7784 = vmatprep.subr.bf16.mxu0 %v9000_v5 }
 0x240   :  { %7373 = vmatmul.mubr.f32.vlgmr.msra.gmra.mrb[10].mxu0 %v9059_v13 }
 0x241   :  { %7786 = vmatpush3.bf16.msra.mxu0 %v9000_v5  ;;  %7383 = vmatprep.mubr.f32.mxu0 %v4974_v47 }
 0x242   :  { %7788 = vmatprep.subr.bf16.mxu0 %v9009_v25 }
 0x245   :  { %7790 = vmatpush3.bf16.msra.mxu0 %v9009_v25 }
 0x246   :  { %7792 = vmatprep.subr.bf16.mxu0 %v8941_v31 }
 0x248   :  { %7384 = vmatmul.mubr.f32.vlgmr.msra.gmra.mrb[10].mxu0 %v4984_v30 }
 0x249   :  { %7794 = vmatpush3.bf16.msra.mxu0 %v8941_v31  ;;  %7394 = vmatprep.mubr.f32.mxu0 %v4975_v62 }
 0x24a   :  { %7796 = vmatprep.subr.bf16.mxu0 %v8973_v52 }
 0x24d   :  { %7798 = vmatpush3.bf16.msra.mxu0 %v8973_v52 }
 0x24e   :  { %7800 = vmatprep.subr.bf16.mxu0 %v9034_v11  ;;  %s8032_s15 = spop %8031 }
 0x24f   :  { %s4824_s16 = smul.f32 1.4142135, %s8032_s15 }
 0x250   :  { %7395 = vmatmul.mubr.f32.vlgmr.msra.gmra.mrb[10].mxu0 %v4985_v12 }
 0x251   :  { %7802 = vmatpush3.bf16.msra.mxu0 %v9034_v11  ;;  %7405 = vmatprep.mubr.f32.mxu0 %v9039_v3  ;;  %v4825_v63 = vstv %s4824_s16 }
 0x252   :  { %7804 = vmatprep.subr.bf16.mxu0 %v9049_v58 }
 0x255   :  { %7806 = vmatpush3.bf16.msra.mxu0 %v9049_v58 }
 0x256   :  { %7808 = vmatprep.subr.bf16.mxu0 %v8941_v31 }
 0x258   :  { %7406 = vmatmul.mubr.f32.vlgmr.msra.gmra.mrb[10].mxu0 %v9059_v13 }
 0x259   :  { %7810 = vmatpush3.bf16.msra.mxu0 %v8941_v31  ;;  %7416 = vmatprep.mubr.f32.mxu0 %v9039_v3 }
 0x25a   :  { %7812 = vmatprep.subr.bf16.mxu0 %v8973_v52 }
 0x25d   :  { %7814 = vmatpush3.bf16.msra.mxu0 %v8973_v52 }
 0x25e   :  { %7864 = vmatprep.subr.bf16.mxu0 %v8941_v31 }
 0x260   :  { %7417 = vmatmul.mubr.f32.vlgmr.msra.gmra.mrb[10].mxu0 %v9059_v13 }
 0x261   :  { %7866 = vmatpush3.bf16.msra.mxu0 %v8941_v31  ;;  %7493 = vmatprep.mubr.f32.mxu0 %v6071_v49 }
 0x262   :  { %7868 = vmatprep.subr.bf16.mxu0 %v8973_v52 }
 0x265   :  { %7870 = vmatpush3.bf16.msra.mxu0 %v8973_v52 }
 0x266   :  { %7872 = vmatprep.subr.bf16.mxu0 %v8983_v57 }
 0x268   :  { %7494 = vmatmul.mubr.f32.vlgmr.msra.gmra.mrb[12].mxu0 %v6081_v28 }
 0x269   :  { %7874 = vmatpush3.bf16.msra.mxu0 %v8983_v57  ;;  %7504 = vmatprep.mubr.f32.mxu0 %v6067_v59 }
 0x26a   :  { %7876 = vmatprep.subr.bf16.mxu0 %v8992_v51 }
 0x26d   :  { %7878 = vmatpush3.bf16.msra.mxu0 %v8992_v51 }
 0x26e   :  { %7880 = vmatprep.subr.bf16.mxu0 %v9000_v5 }
 0x270   :  { %7505 = vmatmul.mubr.f32.vlgmr.msra.gmra.mrb[12].mxu0 %v6077_v18 }
 0x271   :  { %7882 = vmatpush3.bf16.msra.mxu0 %v9000_v5  ;;  %7515 = vmatprep.mubr.f32.mxu0 %v6068_v2 }
 0x272   :  { %7884 = vmatprep.subr.bf16.mxu0 %v9009_v25 }
 0x275   :  { %7886 = vmatpush3.bf16.msra.mxu0 %v9009_v25 }
 0x276   :  { %7888 = vmatprep.subr.bf16.mxu0 %v8941_v31 }
 0x278   :  { %7516 = vmatmul.mubr.f32.vlgmr.msra.gmra.mrb[12].mxu0 %v6078_v14 }
 0x279   :  { %7890 = vmatpush3.bf16.msra.mxu0 %v8941_v31  ;;  %7526 = vmatprep.mubr.f32.mxu0 %v6069_v37 }
 0x27a   :  { %7892 = vmatprep.subr.bf16.mxu0 %v8973_v52 }
 0x27d   :  { %7894 = vmatpush3.bf16.msra.mxu0 %v8973_v52 }
 0x27e   :  { %7896 = vmatprep.subr.bf16.mxu0 %v9034_v11 }
 0x280   :  { %7527 = vmatmul.mubr.f32.vlgmr.msra.gmra.mrb[12].mxu0 %v6079_v20 }
 0x281   :  { %7898 = vmatpush3.bf16.msra.mxu0 %v9034_v11  ;;  %7537 = vmatprep.mubr.f32.mxu0 %v6067_v59 }
 0x282   :  { %7900 = vmatprep.subr.bf16.mxu0 %v9049_v58 }
 0x285   :  { %7902 = vmatpush3.bf16.msra.mxu0 %v9049_v58 }
 0x286   :  { %7904 = vmatprep.subr.bf16.mxu0 %v8941_v31 }
 0x288   :  { %7538 = vmatmul.mubr.f32.vlgmr.msra.gmra.mrb[12].mxu0 %v6077_v18 }
 0x289   :  { %7906 = vmatpush3.bf16.msra.mxu0 %v8941_v31  ;;  %7548 = vmatprep.mubr.f32.mxu0 %v6067_v59 }
 0x28a   :  { %7908 = vmatprep.subr.bf16.mxu0 %v8973_v52 }
 0x28d   :  { %7910 = vmatpush3.bf16.msra.mxu0 %v8973_v52 }
 0x290   :  { %7549 = vmatmul.mubr.f32.vlgmr.msra.gmra.mrb[12].mxu0 %v6077_v18 }
 0x2d7   :  { %v7268_v15 = vpop.f32.mrb[6].mxu0  ;;  %v7352_v43 = vpop.f32.mrb[8].mxu1 }
 0x2d8   :  { %8054 = vrcp.f32 %v7268_v15  ;;  %v3795_v35 = vpop.f32.mrb[7].mxu0  ;;  %v4809_v21 = vpop.f32.mrb[9].mxu1 }
 0x2d9   :  { %8056 = vrcp.f32 %v3795_v35 }
 0x2e2   :  { %v8055_v23 = vpop.eup %8054 }
 0x2e3   :  { %v8057_v27 = vpop.eup %8056  ;;  %v3808_v8 = vmul.f32 %v8055_v23, %v7268_v15 }
 0x2e4   :  { %v3807_v56 = vmul.f32 %v8057_v27, %v3795_v35 }
 0x2e5   :  { %v3810_v32 = vsub.f32 2.0, %v3808_v8 }
 0x2e6   :  { %v3809_v31 = vsub.f32 2.0, %v3807_v56 }
 0x2e7   :  { %v3812_v33 = vmul.f32 %v8055_v23, %v3810_v32 }
 0x2e8   :  { %v3811_v34 = vmul.f32 %v8057_v27, %v3809_v31 }
 0x2e9   :  { %v4820_v39 = vmul.f32 %v7352_v43, %v3812_v33 }
 0x2ea   :  { %v4819_v60 = vmul.f32 %v4809_v21, %v3811_v34 }
 0x2eb   :  { %v4831_v41 = vmul.f32 %v4825_v63, %v4820_v39 }
 0x2ec   :  { %v4830_v45 = vmul.f32 %v4825_v63, %v4819_v60 }
 0x2ed   :  { %8058 = vtanh.f32 %v4831_v41 }
 0x2ee   :  { %8060 = vtanh.f32 %v4830_v45 }
 0x2f7   :  { %v8059_v46 = vpop.eup %8058 }
 0x2f8   :  { %v8061_v54 = vpop.eup %8060  ;;  %v4850_v44 = vmul.f32 0.70710677, %v8059_v46  ;;  %v4867_v19 = vmul.f32 %v8059_v46, %v8059_v46 }
 0x2f9   :  { %v4849_v50 = vmul.f32 0.70710677, %v8061_v54  ;;  %v4866_v58 = vmul.f32 %v8061_v54, %v8061_v54 }
 0x2fa   :  { %v4852_v52 = vmul.f32 %v8760_v10, %v4850_v44 }
 0x2fb   :  { %v4851_v53 = vmul.f32 %v4849_v50, %v8762_v16 }
 0x2fc   :  { %4857 = vrot.lane.b32.xlu1 %v4852_v52, %s8165_s17 }
 0x300   :  { %4855 = vrot.lane.b32.xlu1 %v4851_v53, %s8165_s17 }
 0x303   :  { %v7310_v55 = vpop.f32.mrb[8].mxu0 }
 0x304   :  { %v4316_v57 = vmul.f32 %v7310_v55, %v3812_v33  ;;  %v4305_v0 = vpop.f32.mrb[9].mxu0 }
 0x305   :  { %v4315_v1 = vmul.f32 %v4305_v0, %v3811_v34 }
 0x306   :  { %v4827_v61 = vmul.f32 %v4825_v63, %v4316_v57 }
 0x307   :  { %v4826_v51 = vmul.f32 %v4825_v63, %v4315_v1  ;;  %v7484_v5 = vpop.f32.mrb[10].mxu1 }
 0x308   :  { %8062 = vtanh.f32 %v4827_v61  ;;  %v5972_v25 = vpop.f32.mrb[11].mxu1 }
 0x309   :  { %8064 = vtanh.f32 %v4826_v51 }
 0x312   :  { %v8063_v48 = vpop.eup %8062 }
 0x313   :  { %v8065_v29 = vpop.eup %8064  ;;  %v4835_v7 = vmul.f32 0.70710677, %v8063_v48  ;;  %v4865_v11 = vmul.f32 %v8063_v48, %v8063_v48 }
 0x314   :  { %v4834_v3 = vmul.f32 0.70710677, %v8065_v29  ;;  %v4864_v22 = vmul.f32 %v8065_v29, %v8065_v29 }
 0x315   :  { %v4837_v26 = vmul.f32 %v8760_v10, %v4835_v7  ;;  %v4869_v47 = vadd.f32 %v4867_v19, %v4865_v11 }
 0x316   :  { %v4836_v13 = vmul.f32 %v4834_v3, %v8762_v16  ;;  %v4868_v62 = vadd.f32 %v4866_v58, %v4864_v22 }
 0x317   :  { %4842 = vrot.lane.b32.xlu0 %v4837_v26, %s8166_s6  ;;  %v4871_v30 = vmul.f32 0.5, %v4869_v47 }
 0x318   :  { %v4870_v17 = vmul.f32 0.5, %v4868_v62 }
 0x319   :  { %v4873_v12 = vsub.f32 1.0, %v4871_v30 }
 0x31a   :  { %v4872_v6 = vsub.f32 1.0, %v4870_v17 }
 0x31b   :  { %4840 = vrot.lane.b32.xlu0 %v4836_v13, %s8166_s6  ;;  %v4875_v4 = vmul.f32 %v8760_v10, %v4873_v12 }
 0x31c   :  { %v4874_v9 = vmul.f32 %v4872_v6, %v8762_v16 }
 0x31d   :  { %4880 = vrot.lane.b32.xlu1 %v4875_v4, %s8167_s7 }
 0x31f   :  { %4878 = vrot.lane.b32.xlu0 %v4874_v9, %s8167_s7 }
 0x333   :  { %v7418_v38 = vpop.f32.mrb[10].mxu0 }
 0x334   :  { %8066 = vrcp.f32 %v7418_v38  ;;  %v5422_v59 = vpop.f32.mrb[11].mxu0 }
 0x335   :  { %8068 = vrcp.f32 %v5422_v59 }
 0x33e   :  { %v8067_v2 = vpop.eup %8066 }
 0x33f   :  { %v8069_v42 = vpop.eup %8068  ;;  %v5435_v18 = vmul.f32 %v8067_v2, %v7418_v38 }
 0x340   :  { %v5434_v37 = vmul.f32 %v8069_v42, %v5422_v59 }
 0x341   :  { %v5437_v14 = vsub.f32 2.0, %v5435_v18 }
 0x342   :  { %v5436_v40 = vsub.f32 2.0, %v5434_v37 }
 0x343   :  { %v5439_v20 = vmul.f32 %v8067_v2, %v5437_v14 }
 0x344   :  { %v5438_v49 = vmul.f32 %v8069_v42, %v5436_v40 }
 0x345   :  { %v6529_v24 = vadd.f32 %v5439_v20, %v8812_v36  ;;  %v5983_v10 = vmul.f32 %v7484_v5, %v5439_v20  ;;  %v8170_v5 = vmov 0.0  }
 0x346   :  { %v6528_v16 = vadd.f32 %v5438_v49, %v8812_v36  ;;  %v5982_v28 = vmul.f32 %v5972_v25, %v5438_v49 }
 0x347   :  { %8070 = vrcp.f32 %v6529_v24 }
 0x348   :  { %8072 = vrcp.f32 %v6528_v16 }
 0x351   :  { %v8071_v15 = vpop.eup %8070 }
 0x352   :  { %v8073_v43 = vpop.eup %8072  ;;  %v6533_v35 = vmul.f32 %v8071_v15, %v6529_v24 }
 0x353   :  { %v6532_v21 = vmul.f32 %v8073_v43, %v6528_v16 }
 0x354   :  { %v6535_v23 = vsub.f32 2.0, %v6533_v35 }
 0x355   :  { %v6534_v27 = vsub.f32 2.0, %v6532_v21 }
 0x356   :  { %v6537_v8 = vmul.f32 %v8071_v15, %v6535_v23 }
 0x357   :  { %v6536_v56 = vmul.f32 %v8073_v43, %v6534_v27 }
 0x358   :  { %v6539_v32 = vmul.f32 %v6537_v8, %v8812_v36 }
 0x359   :  { %v6538_v31 = vmul.f32 %v6536_v56, %v8812_v36 }
 0x35a   :  { %v6541_v33 = vmul.f32 %v6539_v32, %v5983_v10  ;;  %v6559_v54 = vmul.f32 %v6539_v32, %v5439_v20 }
 0x35b   :  { %v6540_v63 = vmul.f32 %v6538_v31, %v5982_v28  ;;  %v6558_v44 = vmul.f32 %v6538_v31, %v5438_v49 }
 0x363   :  { %v7550_v34 = vpop.f32.mrb[12].mxu0 }
 0x364   :  { %v6527_v39 = vmul.f32 %v7550_v34, %v5439_v20  ;;  %v6516_v60 = vpop.f32.mrb[13].mxu0 }
 0x365   :  { %v6526_v41 = vmul.f32 %v6516_v60, %v5438_v49 }
 0x366   :  { %v6546_v45 = vmul.f32 %v6539_v32, %v6527_v39 }
 0x367   :  { %v6545_v46 = vmul.f32 %v6538_v31, %v6526_v41 }
 0x368   :  { %6551 = vrot.lane.b32.xlu1 %v6546_v45, %s8168_s18 }
 0x369   :  { %6549 = vrot.lane.b32.xlu0 %v6545_v46, %s8168_s18 }
 0x36c   :  { %6564 = vrot.lane.b32.xlu1 %v6559_v54, %s8162_s24 }
 0x36d   :  { %6562 = vrot.lane.b32.xlu0 %v6558_v44, %s8162_s24 }
 0x36e   :  { %v4858_v50 = vpop.permute.xlu1 %4857 }
 0x372   :  { %v4856_v52 = vpop.permute.xlu1 %4855 }
 0x389   :  { %v4843_v36 = vpop.permute.xlu0 %4842 }
 0x38a   :  { %4848 = vst.msk [vmem:[#allocation9 + $0x8] sm:$0xff] %vm4846_vm3, %v4843_v36 }
 0x38b   :  { %4863 = vst.msk [vmem:[#allocation9 + $0x8] sm:$0xff] %vm4861_vm4, %v4858_v50 }
 0x38d   :  { %v4841_v53 = vpop.permute.xlu0 %4840 }
 0x38e   :  { %4847 = vst.msk [vmem:[#allocation9] sm:$0xff] %vm4846_vm3, %v4841_v53 }
 0x38f   :  { %4862 = vst.msk [vmem:[#allocation9] sm:$0xff] %vm4861_vm4, %v4856_v52  ;;  %v4881_v55 = vpop.permute.xlu1 %4880 }
 0x390   :  { %4886 = vst.msk [vmem:[#allocation9 + $0x8] sm:$0xff] %vm4884_vm5, %v4881_v55 }
 0x391   :  { %v4879_v57 = vpop.permute.xlu0 %4878  ;;  %6544 = vst.msk [vmem:[#allocation9 + $0x8] sm:$0xff] %vm6542_vm6, %v6541_v33 }
 0x392   :  { %4885 = vst.msk [vmem:[#allocation9] sm:$0xff] %vm4884_vm5, %v4879_v57 }
 0x393   :  { %6543 = vst.msk [vmem:[#allocation9] sm:$0xff] %vm6542_vm6, %v6540_v63 }
 0x3da   :  { %v6552_v0 = vpop.permute.xlu1 %6551 }
 0x3db   :  { %6557 = vst.msk [vmem:[#allocation9 + $0x8] sm:$0xff] %vm6555_vm7, %v6552_v0  ;;  %v6550_v1 = vpop.permute.xlu0 %6549 }
 0x3dc   :  { %6556 = vst.msk [vmem:[#allocation9] sm:$0xff] %vm6555_vm7, %v6550_v1 }
 0x3de   :  { %v6565_v61 = vpop.permute.xlu1 %6564 }
 0x3df   :  { %6570 = vst.msk [vmem:[#allocation9 + $0x8] sm:$0xff] %vm6568_vm8, %v6565_v61  ;;  %v6563_v51 = vpop.permute.xlu0 %6562 }
 0x3e0   :  { %6569 = vst.msk [vmem:[#allocation9] sm:$0xff] %vm6568_vm8, %v6563_v51 }
 0x3e1   :  { %6573 = vst.msk [vmem:[#allocation9 + $0x8] sm:$0xff] %vm6571_vm9, %v8170_v5  ;;  %6572 = vst.msk [vmem:[#allocation9] sm:$0xff] %vm6571_vm9, %v8170_v5 }
 0x3e2   :  { %8141 = shalt.err (!%p8138_p11)
}
 0x3e3   :  { %s9176_s4 = sld [smem:[#allocation14_spill]] }
 0x3e9   :  { %s8142_s22 = scalar_lea.hbm %s9176_s4, 256 }
 0x3ea   :  { %p8143_p12 = scmp.ne.s32.totalorder %s9176_s4, %s8142_s22  ;;  %p8146_p13 = scmp.lt.u32.totalorder %s8142_s22, %s9176_s4 }
 0x3ec   :  { %p8148_p0 = pnand %p8146_p13, %p8143_p12 }
 0x3ee   :  { %8151 = shalt.err (!%p8148_p0)
}
 0x3ef   :  { %6585 = dma.vmem_to_hbm [thread:$0]  %s6580_s8, 256, %s9176_s4, [#allocation4], %s8161_s23, %s8161_s23, %s8162_s24  }
 0x3f0   :  { %8158 = dma.done.wait [#allocation4], 256  }
 0x3f1   :  { %8159 = vsyncadd [#allocation4], 4294967040 }
 0x3f2   :  { %6589 = vsyncpa [#allocation3], 1 }
 0x3f3   :  { %6590 = vsyncpa [#allocation7], 1 }
 0x3f4   :  { %6591 = vsyncpa [#allocation4], 1 }
 0x3f5   :  { %6592 = vsyncpa [#allocation5], 1 }

</bundles_post_ra>
